<compile_context>
chip_gen: v6e
topology: v6e:2x2x1
jax: 0.10.0
libtpu: 0.0.40
codegen_flags: <defaults>
</compile_context>

<pallas_src>
import jax
import jax.numpy as jnp
from jax import lax
from jax.experimental import pallas as pl
from jax.experimental.pallas import tpu as pltpu

INPUT_SIZE = 7
HIDDEN = 64
NUM_CLASSES = 4


def weather_lstm_kernel(x_ref, w_in_ref, w_rec_ref, fc_ref, out_ref, xproj_ref):
    T, bt, _ = x_ref.shape
    H = HIDDEN

    # ---- Phase 1 (off the serial path): input projection for ALL timesteps
    # plus both layers' biases (via the ones column of x_aug), one matmul.
    x_flat = x_ref[...].reshape(T * bt, INPUT_SIZE + 1)
    xproj_ref[...] = jnp.dot(
        x_flat, w_in_ref[...], preferred_element_type=jnp.float32
    ).reshape(T, bt, 8 * H)

    w_rec = w_rec_ref[...]  # (2H, 8H) bf16, hoisted out of the loop

    def sig(z):
        # sigmoid(x) == 0.5*tanh(0.5x) + 0.5 : one EUP tanh + VPU FMA.
        return 0.5 * jnp.tanh(0.5 * z) + 0.5

    def packed_cell(gates, cp):
        # gates: (bt, 8H), cols [i0,i1,f0,f1,o0,o1,g0,g1]; cp: (bt, 2H)=[c0|c1]
        s = sig(gates[:, 0:6 * H])                 # one contiguous sigmoid slab
        g = jnp.tanh(gates[:, 6 * H:8 * H])        # one contiguous tanh slab
        i_b = s[:, 0:2 * H]
        f_b = s[:, 2 * H:4 * H]
        o_b = s[:, 4 * H:6 * H]
        cp_new = f_b * cp + i_b * g
        hp_new = o_b * jnp.tanh(cp_new)            # [h0_new | h1_new]
        return hp_new, cp_new

    # Prologue: layer-0 of step 0 (previous states are all zero).  The layer-1
    # half of this result is meaningless (it only sees b1) -> zero it out.
    hp, cp = packed_cell(xproj_ref[0], jnp.zeros((bt, 2 * H), jnp.float32))
    l0_mask = lax.broadcasted_iota(jnp.int32, (bt, 2 * H), 1) < H
    hp = jnp.where(l0_mask, hp, 0.0)
    cp = jnp.where(l0_mask, cp, 0.0)

    # Pipelined steps: iteration t does layer-1 of step t AND layer-0 of step
    # t+1 with a single fused bf16 matmul.  hp = [h0_t | h1_{t-1}].
    def step(t, carry):
        hp, cp = carry
        comb = jnp.dot(hp.astype(jnp.bfloat16), w_rec,
                       preferred_element_type=jnp.float32)
        return packed_cell(comb + xproj_ref[t + 1], cp)

    unroll = min(max(T - 1, 1), 8)                 # bounded unroll for long T
    hp, cp = lax.fori_loop(0, T - 1, step, (hp, cp), unroll=unroll)

    # Epilogue: layer-1 of step T-1.  xproj_ref[0]'s layer-1 columns hold b1;
    # the layer-0 half computed here is discarded (FC rows for it are zero).
    comb = jnp.dot(hp.astype(jnp.bfloat16), w_rec,
                   preferred_element_type=jnp.float32)
    hp, _ = packed_cell(comb + xproj_ref[0], cp)

    # Dropout(0.2) is identity in eval mode; FC head with lane-padded output.
    # TODO(synk): training-mode stochastic dropout (p=0.2) not implemented;
    #             eval semantics used.
    out_ref[...] = (
        jnp.dot(hp, fc_ref[0:2 * H, :], preferred_element_type=jnp.float32)
        + fc_ref[2 * H:2 * H + 1, :]
    )


def _is_multi_tensorcore_chip():
    # v7x has 2 TensorCores per chip; only there does a batch-split grid axis
    # pay off (on v5e/v6e it would just serialize the recurrence twice).
    try:
        return "v7" in jax.devices()[0].device_kind.lower()
    except Exception:
        return False


def _pack_weights(params):
    H, F, N = HIDDEN, INPUT_SIZE, NUM_CLASSES
    f32 = jnp.float32

    def gates(w):  # split PyTorch [i,f,g,o] stacking along axis 0
        w = jnp.asarray(w, f32)
        return {"i": w[0:H], "f": w[H:2 * H], "g": w[2 * H:3 * H], "o": w[3 * H:4 * H]}

    wih0 = gates(params["w_ih_l0"])                       # (H, F) each
    whh0 = gates(params["w_hh_l0"])                       # (H, H)
    wih1 = gates(params["w_ih_l1"])                       # (H, H)
    whh1 = gates(params["w_hh_l1"])                       # (H, H)
    b0 = gates(params["b_ih_l0"] + params["b_hh_l0"])     # (H,)
    b1 = gates(params["b_ih_l1"] + params["b_hh_l1"])     # (H,)

    zH = jnp.zeros((H, H), f32)
    zF = jnp.zeros((F, H), f32)
    order = ("i", "f", "o", "g")   # per-gate; column layout [g0-block, g1-block]

    # Fused recurrent weight: rows 0:H multiply h0_t, rows H:2H multiply h1_{t-1}
    rec_blocks, in_blocks = [], []
    for g in order:
        rec_blocks.append(jnp.concatenate([whh0[g].T, zH], axis=0))           # layer-0 cols
        rec_blocks.append(jnp.concatenate([wih1[g].T, whh1[g].T], axis=0))    # layer-1 cols
        in_blocks.append(jnp.concatenate([wih0[g].T, b0[g][None, :]], axis=0))  # (F+1, H)
        in_blocks.append(jnp.concatenate([zF, b1[g][None, :]], axis=0))         # (F+1, H)
    w_rec = jnp.concatenate(rec_blocks, axis=1).astype(jnp.bfloat16)   # (2H, 8H)
    w_in = jnp.concatenate(in_blocks, axis=1)                          # (F+1, 8H) f32

    # FC head slab: rows 0:H zero (kill the discarded layer-0 half of hp),
    # rows H:2H = wfc (lane-padded to 128), row 2H = bias row, pad to 136 rows.
    wfc_full = jnp.zeros((2 * H, 128), f32).at[H:2 * H, 0:N].set(
        jnp.asarray(params["w_fc"], f32).T)
    bfc_row = jnp.zeros((1, 128), f32).at[0, 0:N].set(jnp.asarray(params["b_fc"], f32))
    fc_slab = jnp.concatenate([wfc_full, bfc_row, jnp.zeros((7, 128), f32)], axis=0)

    return w_in, w_rec, fc_slab


def weather_lstm_forward(x, params):
    """x: (B, T, INPUT_SIZE). Returns (B, NUM_CLASSES) float32 (eval-mode)."""
    B, T, F = x.shape
    assert F == INPUT_SIZE
    H = HIDDEN

    # Batch padding / tiling.  One tile normally; two tiles only on multi-TC
    # chips (v7x) with B > 8 so each TensorCore takes half the batch.
    if _is_multi_tensorcore_chip() and B > 8:
        Bp = ((B + 15) // 16) * 16
        n_tiles = 2
    else:
        Bp = max(8, ((B + 7) // 8) * 8)
        n_tiles = 1
    bt = Bp // n_tiles

    x_tbf = jnp.transpose(x.astype(jnp.float32), (1, 0, 2))         # (T, B, F)
    if Bp != B:
        x_tbf = jnp.pad(x_tbf, ((0, 0), (0, Bp - B), (0, 0)))
    x_aug = jnp.concatenate([x_tbf, jnp.ones((T, Bp, 1), jnp.float32)], axis=-1)

    w_in, w_rec, fc_slab = _pack_weights(params)

    # VMEM budget: the (T, bt, 8H) xproj scratch dominates at large T.
    # TODO(synk): chunk the xproj phase over T for very long sequences
    #             (v5e 16 MiB default scoped VMEM / v7x 64 MiB physical).
    xproj_bytes = T * bt * 8 * H * 4
    io_bytes = (x_aug.size * 4 + w_in.size * 4 + w_rec.size * 2
                + fc_slab.size * 4 + Bp * 128 * 4)
    vmem_limit = int(min(max(2 * (xproj_bytes + io_bytes) + (1 << 20), 16 << 20),
                         48 << 20))

    out = pl.pallas_call(
        weather_lstm_kernel,
        out_shape=jax.ShapeDtypeStruct((Bp, 128), jnp.float32),
        grid=(n_tiles,),
        in_specs=[
            pl.BlockSpec((T, bt, INPUT_SIZE + 1), lambda i: (0, i, 0)),
            pl.BlockSpec(w_in.shape, lambda i: (0, 0)),
            pl.BlockSpec(w_rec.shape, lambda i: (0, 0)),
            pl.BlockSpec(fc_slab.shape, lambda i: (0, 0)),
        ],
        out_specs=pl.BlockSpec((bt, 128), lambda i: (i, 0)),
        scratch_shapes=[pltpu.VMEM((T, bt, 8 * H), jnp.float32)],
        compiler_params=pltpu.CompilerParams(
            dimension_semantics=("parallel",),
            vmem_limit_bytes=vmem_limit),
    )(x_aug, w_in, w_rec, fc_slab)

    return out[:B, :NUM_CLASSES]


def init_params(key):
    ks = jax.random.split(key, 10)
    scale = 0.1
    return {
        "w_ih_l0": scale * jax.random.normal(ks[0], (4 * HIDDEN, INPUT_SIZE), jnp.float32),
        "w_hh_l0": scale * jax.random.normal(ks[1], (4 * HIDDEN, HIDDEN), jnp.float32),
        "b_ih_l0": scale * jax.random.normal(ks[2], (4 * HIDDEN,), jnp.float32),
        "b_hh_l0": scale * jax.random.normal(ks[3], (4 * HIDDEN,), jnp.float32),
        "w_ih_l1": scale * jax.random.normal(ks[4], (4 * HIDDEN, HIDDEN), jnp.float32),
        "w_hh_l1": scale * jax.random.normal(ks[5], (4 * HIDDEN, HIDDEN), jnp.float32),
        "b_ih_l1": scale * jax.random.normal(ks[6], (4 * HIDDEN,), jnp.float32),
        "b_hh_l1": scale * jax.random.normal(ks[7], (4 * HIDDEN,), jnp.float32),
        "w_fc": scale * jax.random.normal(ks[8], (NUM_CLASSES, HIDDEN), jnp.float32),
        "b_fc": scale * jax.random.normal(ks[9], (NUM_CLASSES,), jnp.float32),
    }


def weather_lstm_ref(x, params):
    """Pure-JAX f32 reference of the PyTorch forward (eval-mode dropout)."""
    B, T, F = x.shape

    def cell(inp, h, c, wih, whh, bih, bhh):
        gates = inp @ wih.T + bih + h @ whh.T + bhh
        i, f, g, o = jnp.split(gates, 4, axis=-1)
        c_new = jax.nn.sigmoid(f) * c + jax.nn.sigmoid(i) * jnp.tanh(g)
        h_new = jax.nn.sigmoid(o) * jnp.tanh(c_new)
        return h_new, c_new

    def step(carry, xt):
        h0, c0, h1, c1 = carry
        h0, c0 = cell(xt, h0, c0, params["w_ih_l0"], params["w_hh_l0"],
                      params["b_ih_l0"], params["b_hh_l0"])
        h1, c1 = cell(h0, h1, c1, params["w_ih_l1"], params["w_hh_l1"],
                      params["b_ih_l1"], params["b_hh_l1"])
        return (h0, c0, h1, c1), None

    z = jnp.zeros((B, HIDDEN), jnp.float32)
    (h0, c0, h1, c1), _ = lax.scan(step, (z, z, z, z), jnp.transpose(x, (1, 0, 2)))
    return h1 @ params["w_fc"].T + params["b_fc"]


if __name__ == "__main__":
    key = jax.random.PRNGKey(0)
    k_x, k_p = jax.random.split(key)
    B, T = 2, 8
    x = jax.random.normal(k_x, (B, T, INPUT_SIZE), jnp.float32)
    params = init_params(k_p)

    out = weather_lstm_forward(x, params)
    out = jax.block_until_ready(out)

    ref = weather_lstm_ref(x, params)
    assert out.shape == (B, NUM_CLASSES)
    # Tolerance loosened (vs 1e-4) because the recurrent matmuls use bf16
    # operands with f32 accumulation, per the perf review.
    assert jnp.allclose(out, ref, rtol=2e-2, atol=2e-2), (out, ref)

    print("KERNEL_OK")
</pallas_src>

<mosaic_0001>
module attributes {stable_mosaic.version = 11 : i64} {
  func.func @weather_lstm_kernel(%arg0: i32, %arg1: memref<8x8x8xf32, #tpu.memory_space<vmem>>, %arg2: memref<8x512xf32, #tpu.memory_space<vmem>>, %arg3: memref<128x512xbf16, #tpu.memory_space<vmem>>, %arg4: memref<136x128xf32, #tpu.memory_space<vmem>>, %arg5: memref<8x128xf32, #tpu.memory_space<vmem>>, %arg6: memref<8x8x512xf32, #tpu.memory_space<vmem>>) attributes {dimension_semantics = [#tpu.dimension_semantics<parallel>], iteration_bounds = array<i64: 1>, scalar_prefetch = 0 : i64, scratch_operands = 1 : i64, tpu.core_type = #tpu.core_type<tc>, window_params = [{transform_indices = @transform_0, window_bounds = array<i64: 8, 8, 8>}, {pipeline_mode = #tpu.pipeline_mode<synchronous>, transform_indices = @transform_1, window_bounds = array<i64: 8, 512>}, {pipeline_mode = #tpu.pipeline_mode<synchronous>, transform_indices = @transform_2, window_bounds = array<i64: 128, 512>}, {pipeline_mode = #tpu.pipeline_mode<synchronous>, transform_indices = @transform_3, window_bounds = array<i64: 136, 128>}, {transform_indices = @transform_4, window_bounds = array<i64: 8, 128>}]} {
    %c0 = arith.constant 0 : index
    %c0_0 = arith.constant 0 : index
    %c0_1 = arith.constant 0 : index
    %0 = vector.load %arg1[%c0, %c0_0, %c0_1] : memref<8x8x8xf32, #tpu.memory_space<vmem>>, vector<8x8x8xf32>
    %1 = vector.shape_cast %0 : vector<8x8x8xf32> to vector<64x8xf32>
    %c0_2 = arith.constant 0 : index
    %c0_3 = arith.constant 0 : index
    %2 = vector.load %arg2[%c0_2, %c0_3] : memref<8x512xf32, #tpu.memory_space<vmem>>, vector<8x512xf32>
    %cst = arith.constant dense<0.000000e+00> : vector<64x512xf32>
    %3 = tpu.matmul %1, %2, %cst {dimension_numbers = #tpu.dot_dimension_numbers<[1], [0], [0], [1], [0, 0, 1, 1], [], []>} : vector<64x8xf32>, vector<8x512xf32>, vector<64x512xf32> -> vector<64x512xf32>
    %4 = vector.shape_cast %3 : vector<64x512xf32> to vector<8x8x512xf32>
    %c0_4 = arith.constant 0 : index
    %c0_5 = arith.constant 0 : index
    %c0_6 = arith.constant 0 : index
    %5 = vector.load %arg6[%c0_4, %c0_5, %c0_6] : memref<8x8x512xf32, #tpu.memory_space<vmem>>, vector<8x8x512xf32>
    tpu.vector_store %arg6[%c0_4, %c0_5, %c0_6], %4 {strides = array<i32>} : memref<8x8x512xf32, #tpu.memory_space<vmem>>, vector<8x8x512xf32>,
    %c0_7 = arith.constant 0 : index
    %c0_8 = arith.constant 0 : index
    %6 = vector.load %arg3[%c0_7, %c0_8] : memref<128x512xbf16, #tpu.memory_space<vmem>>, vector<128x512xbf16>
    %c0_9 = arith.constant 0 : index
    %c0_10 = arith.constant 0 : index
    %c0_11 = arith.constant 0 : index
    %7 = vector.load %arg6[%c0_9, %c0_10, %c0_11] : memref<8x8x512xf32, #tpu.memory_space<vmem>>, vector<1x8x512xf32>
    %8 = vector.shape_cast %7 : vector<1x8x512xf32> to vector<8x512xf32>
    %cst_12 = arith.constant 0.000000e+00 : f32
    %9 = vector.broadcast %cst_12 : f32 to vector<8x128xf32>
    %10 = vector.extract_strided_slice %8 {offsets = [0, 0], sizes = [8, 384], strides = [1, 1]} : vector<8x512xf32> to vector<8x384xf32>
    %cst_13 = arith.constant 5.000000e-01 : f32
    %11 = vector.broadcast %cst_13 : f32 to vector<8x384xf32>
    %12 = arith.mulf %11, %10 : vector<8x384xf32>
    %13 = math.tanh %12 : vector<8x384xf32>
    %cst_14 = arith.constant 5.000000e-01 : f32
    %14 = vector.broadcast %cst_14 : f32 to vector<8x384xf32>
    %15 = arith.mulf %14, %13 : vector<8x384xf32>
    %cst_15 = arith.constant 5.000000e-01 : f32
    %16 = vector.broadcast %cst_15 : f32 to vector<8x384xf32>
    %17 = arith.addf %15, %16 : vector<8x384xf32>
    %18 = vector.extract_strided_slice %8 {offsets = [0, 384], sizes = [8, 128], strides = [1, 1]} : vector<8x512xf32> to vector<8x128xf32>
    %19 = math.tanh %18 : vector<8x128xf32>
    %20 = vector.extract_strided_slice %17 {offsets = [0, 0], sizes = [8, 128], strides = [1, 1]} : vector<8x384xf32> to vector<8x128xf32>
    %21 = vector.extract_strided_slice %17 {offsets = [0, 128], sizes = [8, 128], strides = [1, 1]} : vector<8x384xf32> to vector<8x128xf32>
    %22 = vector.extract_strided_slice %17 {offsets = [0, 256], sizes = [8, 128], strides = [1, 1]} : vector<8x384xf32> to vector<8x128xf32>
    %23 = arith.mulf %21, %9 : vector<8x128xf32>
    %24 = arith.mulf %20, %19 : vector<8x128xf32>
    %25 = arith.addf %23, %24 : vector<8x128xf32>
    %26 = math.tanh %25 : vector<8x128xf32>
    %27 = arith.mulf %22, %26 : vector<8x128xf32>
    %28 = tpu.iota {dimensions = array<i32: 1>} : vector<8x128xi32>
    %c64_i32 = arith.constant 64 : i32
    %29 = vector.broadcast %c64_i32 : i32 to vector<8x128xi32>
    %30 = arith.cmpi slt, %28, %29 : vector<8x128xi32>
    %cst_16 = arith.constant 0.000000e+00 : f32
    %31 = vector.broadcast %cst_16 : f32 to vector<8x128xf32>
    %32 = arith.select %30, %27, %31 : vector<8x128xi1>, vector<8x128xf32>
    %cst_17 = arith.constant 0.000000e+00 : f32
    %33 = vector.broadcast %cst_17 : f32 to vector<8x128xf32>
    %34 = arith.select %30, %25, %33 : vector<8x128xi1>, vector<8x128xf32>
    %c0_i32 = arith.constant 0 : i32
    %35 = arith.truncf %32 : vector<8x128xf32> to vector<8x128xbf16>
    %cst_18 = arith.constant dense<0.000000e+00> : vector<8x512xf32>
    %36 = tpu.matmul %35, %6, %cst_18 {dimension_numbers = #tpu.dot_dimension_numbers<[1], [0], [0], [1], [0, 0, 1, 1], [], []>} : vector<8x128xbf16>, vector<128x512xbf16>, vector<8x512xf32> -> vector<8x512xf32>
    %c1_i32 = arith.constant 1 : i32
    %37 = arith.addi %c0_i32, %c1_i32 : i32
    %38 = arith.index_cast %37 : i32 to index
    %c0_19 = arith.constant 0 : index
    %c0_20 = arith.constant 0 : index
    %39 = vector.load %arg6[%38, %c0_19, %c0_20] : memref<8x8x512xf32, #tpu.memory_space<vmem>>, vector<1x8x512xf32>
    %40 = vector.shape_cast %39 : vector<1x8x512xf32> to vector<8x512xf32>
    %41 = arith.addf %36, %40 : vector<8x512xf32>
    %42 = vector.extract_strided_slice %41 {offsets = [0, 0], sizes = [8, 384], strides = [1, 1]} : vector<8x512xf32> to vector<8x384xf32>
    %cst_21 = arith.constant 5.000000e-01 : f32
    %43 = vector.broadcast %cst_21 : f32 to vector<8x384xf32>
    %44 = arith.mulf %43, %42 : vector<8x384xf32>
    %45 = math.tanh %44 : vector<8x384xf32>
    %cst_22 = arith.constant 5.000000e-01 : f32
    %46 = vector.broadcast %cst_22 : f32 to vector<8x384xf32>
    %47 = arith.mulf %46, %45 : vector<8x384xf32>
    %cst_23 = arith.constant 5.000000e-01 : f32
    %48 = vector.broadcast %cst_23 : f32 to vector<8x384xf32>
    %49 = arith.addf %47, %48 : vector<8x384xf32>
    %50 = vector.extract_strided_slice %41 {offsets = [0, 384], sizes = [8, 128], strides = [1, 1]} : vector<8x512xf32> to vector<8x128xf32>
    %51 = math.tanh %50 : vector<8x128xf32>
    %52 = vector.extract_strided_slice %49 {offsets = [0, 0], sizes = [8, 128], strides = [1, 1]} : vector<8x384xf32> to vector<8x128xf32>
    %53 = vector.extract_strided_slice %49 {offsets = [0, 128], sizes = [8, 128], strides = [1, 1]} : vector<8x384xf32> to vector<8x128xf32>
    %54 = vector.extract_strided_slice %49 {offsets = [0, 256], sizes = [8, 128], strides = [1, 1]} : vector<8x384xf32> to vector<8x128xf32>
    %55 = arith.mulf %53, %34 : vector<8x128xf32>
    %56 = arith.mulf %52, %51 : vector<8x128xf32>
    %57 = arith.addf %55, %56 : vector<8x128xf32>
    %58 = math.tanh %57 : vector<8x128xf32>
    %59 = arith.mulf %54, %58 : vector<8x128xf32>
    %c1_i32_24 = arith.constant 1 : i32
    %60 = arith.truncf %59 : vector<8x128xf32> to vector<8x128xbf16>
    %cst_25 = arith.constant dense<0.000000e+00> : vector<8x512xf32>
    %61 = tpu.matmul %60, %6, %cst_25 {dimension_numbers = #tpu.dot_dimension_numbers<[1], [0], [0], [1], [0, 0, 1, 1], [], []>} : vector<8x128xbf16>, vector<128x512xbf16>, vector<8x512xf32> -> vector<8x512xf32>
    %c1_i32_26 = arith.constant 1 : i32
    %62 = arith.addi %c1_i32_24, %c1_i32_26 : i32
    %63 = arith.index_cast %62 : i32 to index
    %c0_27 = arith.constant 0 : index
    %c0_28 = arith.constant 0 : index
    %64 = vector.load %arg6[%63, %c0_27, %c0_28] : memref<8x8x512xf32, #tpu.memory_space<vmem>>, vector<1x8x512xf32>
    %65 = vector.shape_cast %64 : vector<1x8x512xf32> to vector<8x512xf32>
    %66 = arith.addf %61, %65 : vector<8x512xf32>
    %67 = vector.extract_strided_slice %66 {offsets = [0, 0], sizes = [8, 384], strides = [1, 1]} : vector<8x512xf32> to vector<8x384xf32>
    %cst_29 = arith.constant 5.000000e-01 : f32
    %68 = vector.broadcast %cst_29 : f32 to vector<8x384xf32>
    %69 = arith.mulf %68, %67 : vector<8x384xf32>
    %70 = math.tanh %69 : vector<8x384xf32>
    %cst_30 = arith.constant 5.000000e-01 : f32
    %71 = vector.broadcast %cst_30 : f32 to vector<8x384xf32>
    %72 = arith.mulf %71, %70 : vector<8x384xf32>
    %cst_31 = arith.constant 5.000000e-01 : f32
    %73 = vector.broadcast %cst_31 : f32 to vector<8x384xf32>
    %74 = arith.addf %72, %73 : vector<8x384xf32>
    %75 = vector.extract_strided_slice %66 {offsets = [0, 384], sizes = [8, 128], strides = [1, 1]} : vector<8x512xf32> to vector<8x128xf32>
    %76 = math.tanh %75 : vector<8x128xf32>
    %77 = vector.extract_strided_slice %74 {offsets = [0, 0], sizes = [8, 128], strides = [1, 1]} : vector<8x384xf32> to vector<8x128xf32>
    %78 = vector.extract_strided_slice %74 {offsets = [0, 128], sizes = [8, 128], strides = [1, 1]} : vector<8x384xf32> to vector<8x128xf32>
    %79 = vector.extract_strided_slice %74 {offsets = [0, 256], sizes = [8, 128], strides = [1, 1]} : vector<8x384xf32> to vector<8x128xf32>
    %80 = arith.mulf %78, %57 : vector<8x128xf32>
    %81 = arith.mulf %77, %76 : vector<8x128xf32>
    %82 = arith.addf %80, %81 : vector<8x128xf32>
    %83 = math.tanh %82 : vector<8x128xf32>
    %84 = arith.mulf %79, %83 : vector<8x128xf32>
    %c2_i32 = arith.constant 2 : i32
    %85 = arith.truncf %84 : vector<8x128xf32> to vector<8x128xbf16>
    %cst_32 = arith.constant dense<0.000000e+00> : vector<8x512xf32>
    %86 = tpu.matmul %85, %6, %cst_32 {dimension_numbers = #tpu.dot_dimension_numbers<[1], [0], [0], [1], [0, 0, 1, 1], [], []>} : vector<8x128xbf16>, vector<128x512xbf16>, vector<8x512xf32> -> vector<8x512xf32>
    %c1_i32_33 = arith.constant 1 : i32
    %87 = arith.addi %c2_i32, %c1_i32_33 : i32
    %88 = arith.index_cast %87 : i32 to index
    %c0_34 = arith.constant 0 : index
    %c0_35 = arith.constant 0 : index
    %89 = vector.load %arg6[%88, %c0_34, %c0_35] : memref<8x8x512xf32, #tpu.memory_space<vmem>>, vector<1x8x512xf32>
    %90 = vector.shape_cast %89 : vector<1x8x512xf32> to vector<8x512xf32>
    %91 = arith.addf %86, %90 : vector<8x512xf32>
    %92 = vector.extract_strided_slice %91 {offsets = [0, 0], sizes = [8, 384], strides = [1, 1]} : vector<8x512xf32> to vector<8x384xf32>
    %cst_36 = arith.constant 5.000000e-01 : f32
    %93 = vector.broadcast %cst_36 : f32 to vector<8x384xf32>
    %94 = arith.mulf %93, %92 : vector<8x384xf32>
    %95 = math.tanh %94 : vector<8x384xf32>
    %cst_37 = arith.constant 5.000000e-01 : f32
    %96 = vector.broadcast %cst_37 : f32 to vector<8x384xf32>
    %97 = arith.mulf %96, %95 : vector<8x384xf32>
    %cst_38 = arith.constant 5.000000e-01 : f32
    %98 = vector.broadcast %cst_38 : f32 to vector<8x384xf32>
    %99 = arith.addf %97, %98 : vector<8x384xf32>
    %100 = vector.extract_strided_slice %91 {offsets = [0, 384], sizes = [8, 128], strides = [1, 1]} : vector<8x512xf32> to vector<8x128xf32>
    %101 = math.tanh %100 : vector<8x128xf32>
    %102 = vector.extract_strided_slice %99 {offsets = [0, 0], sizes = [8, 128], strides = [1, 1]} : vector<8x384xf32> to vector<8x128xf32>
    %103 = vector.extract_strided_slice %99 {offsets = [0, 128], sizes = [8, 128], strides = [1, 1]} : vector<8x384xf32> to vector<8x128xf32>
    %104 = vector.extract_strided_slice %99 {offsets = [0, 256], sizes = [8, 128], strides = [1, 1]} : vector<8x384xf32> to vector<8x128xf32>
    %105 = arith.mulf %103, %82 : vector<8x128xf32>
    %106 = arith.mulf %102, %101 : vector<8x128xf32>
    %107 = arith.addf %105, %106 : vector<8x128xf32>
    %108 = math.tanh %107 : vector<8x128xf32>
    %109 = arith.mulf %104, %108 : vector<8x128xf32>
    %c3_i32 = arith.constant 3 : i32
    %110 = arith.truncf %109 : vector<8x128xf32> to vector<8x128xbf16>
    %cst_39 = arith.constant dense<0.000000e+00> : vector<8x512xf32>
    %111 = tpu.matmul %110, %6, %cst_39 {dimension_numbers = #tpu.dot_dimension_numbers<[1], [0], [0], [1], [0, 0, 1, 1], [], []>} : vector<8x128xbf16>, vector<128x512xbf16>, vector<8x512xf32> -> vector<8x512xf32>
    %c1_i32_40 = arith.constant 1 : i32
    %112 = arith.addi %c3_i32, %c1_i32_40 : i32
    %113 = arith.index_cast %112 : i32 to index
    %c0_41 = arith.constant 0 : index
    %c0_42 = arith.constant 0 : index
    %114 = vector.load %arg6[%113, %c0_41, %c0_42] : memref<8x8x512xf32, #tpu.memory_space<vmem>>, vector<1x8x512xf32>
    %115 = vector.shape_cast %114 : vector<1x8x512xf32> to vector<8x512xf32>
    %116 = arith.addf %111, %115 : vector<8x512xf32>
    %117 = vector.extract_strided_slice %116 {offsets = [0, 0], sizes = [8, 384], strides = [1, 1]} : vector<8x512xf32> to vector<8x384xf32>
    %cst_43 = arith.constant 5.000000e-01 : f32
    %118 = vector.broadcast %cst_43 : f32 to vector<8x384xf32>
    %119 = arith.mulf %118, %117 : vector<8x384xf32>
    %120 = math.tanh %119 : vector<8x384xf32>
    %cst_44 = arith.constant 5.000000e-01 : f32
    %121 = vector.broadcast %cst_44 : f32 to vector<8x384xf32>
    %122 = arith.mulf %121, %120 : vector<8x384xf32>
    %cst_45 = arith.constant 5.000000e-01 : f32
    %123 = vector.broadcast %cst_45 : f32 to vector<8x384xf32>
    %124 = arith.addf %122, %123 : vector<8x384xf32>
    %125 = vector.extract_strided_slice %116 {offsets = [0, 384], sizes = [8, 128], strides = [1, 1]} : vector<8x512xf32> to vector<8x128xf32>
    %126 = math.tanh %125 : vector<8x128xf32>
    %127 = vector.extract_strided_slice %124 {offsets = [0, 0], sizes = [8, 128], strides = [1, 1]} : vector<8x384xf32> to vector<8x128xf32>
    %128 = vector.extract_strided_slice %124 {offsets = [0, 128], sizes = [8, 128], strides = [1, 1]} : vector<8x384xf32> to vector<8x128xf32>
    %129 = vector.extract_strided_slice %124 {offsets = [0, 256], sizes = [8, 128], strides = [1, 1]} : vector<8x384xf32> to vector<8x128xf32>
    %130 = arith.mulf %128, %107 : vector<8x128xf32>
    %131 = arith.mulf %127, %126 : vector<8x128xf32>
    %132 = arith.addf %130, %131 : vector<8x128xf32>
    %133 = math.tanh %132 : vector<8x128xf32>
    %134 = arith.mulf %129, %133 : vector<8x128xf32>
    %c4_i32 = arith.constant 4 : i32
    %135 = arith.truncf %134 : vector<8x128xf32> to vector<8x128xbf16>
    %cst_46 = arith.constant dense<0.000000e+00> : vector<8x512xf32>
    %136 = tpu.matmul %135, %6, %cst_46 {dimension_numbers = #tpu.dot_dimension_numbers<[1], [0], [0], [1], [0, 0, 1, 1], [], []>} : vector<8x128xbf16>, vector<128x512xbf16>, vector<8x512xf32> -> vector<8x512xf32>
    %c1_i32_47 = arith.constant 1 : i32
    %137 = arith.addi %c4_i32, %c1_i32_47 : i32
    %138 = arith.index_cast %137 : i32 to index
    %c0_48 = arith.constant 0 : index
    %c0_49 = arith.constant 0 : index
    %139 = vector.load %arg6[%138, %c0_48, %c0_49] : memref<8x8x512xf32, #tpu.memory_space<vmem>>, vector<1x8x512xf32>
    %140 = vector.shape_cast %139 : vector<1x8x512xf32> to vector<8x512xf32>
    %141 = arith.addf %136, %140 : vector<8x512xf32>
    %142 = vector.extract_strided_slice %141 {offsets = [0, 0], sizes = [8, 384], strides = [1, 1]} : vector<8x512xf32> to vector<8x384xf32>
    %cst_50 = arith.constant 5.000000e-01 : f32
    %143 = vector.broadcast %cst_50 : f32 to vector<8x384xf32>
    %144 = arith.mulf %143, %142 : vector<8x384xf32>
    %145 = math.tanh %144 : vector<8x384xf32>
    %cst_51 = arith.constant 5.000000e-01 : f32
    %146 = vector.broadcast %cst_51 : f32 to vector<8x384xf32>
    %147 = arith.mulf %146, %145 : vector<8x384xf32>
    %cst_52 = arith.constant 5.000000e-01 : f32
    %148 = vector.broadcast %cst_52 : f32 to vector<8x384xf32>
    %149 = arith.addf %147, %148 : vector<8x384xf32>
    %150 = vector.extract_strided_slice %141 {offsets = [0, 384], sizes = [8, 128], strides = [1, 1]} : vector<8x512xf32> to vector<8x128xf32>
    %151 = math.tanh %150 : vector<8x128xf32>
    %152 = vector.extract_strided_slice %149 {offsets = [0, 0], sizes = [8, 128], strides = [1, 1]} : vector<8x384xf32> to vector<8x128xf32>
    %153 = vector.extract_strided_slice %149 {offsets = [0, 128], sizes = [8, 128], strides = [1, 1]} : vector<8x384xf32> to vector<8x128xf32>
    %154 = vector.extract_strided_slice %149 {offsets = [0, 256], sizes = [8, 128], strides = [1, 1]} : vector<8x384xf32> to vector<8x128xf32>
    %155 = arith.mulf %153, %132 : vector<8x128xf32>
    %156 = arith.mulf %152, %151 : vector<8x128xf32>
    %157 = arith.addf %155, %156 : vector<8x128xf32>
    %158 = math.tanh %157 : vector<8x128xf32>
    %159 = arith.mulf %154, %158 : vector<8x128xf32>
    %c5_i32 = arith.constant 5 : i32
    %160 = arith.truncf %159 : vector<8x128xf32> to vector<8x128xbf16>
    %cst_53 = arith.constant dense<0.000000e+00> : vector<8x512xf32>
    %161 = tpu.matmul %160, %6, %cst_53 {dimension_numbers = #tpu.dot_dimension_numbers<[1], [0], [0], [1], [0, 0, 1, 1], [], []>} : vector<8x128xbf16>, vector<128x512xbf16>, vector<8x512xf32> -> vector<8x512xf32>
    %c1_i32_54 = arith.constant 1 : i32
    %162 = arith.addi %c5_i32, %c1_i32_54 : i32
    %163 = arith.index_cast %162 : i32 to index
    %c0_55 = arith.constant 0 : index
    %c0_56 = arith.constant 0 : index
    %164 = vector.load %arg6[%163, %c0_55, %c0_56] : memref<8x8x512xf32, #tpu.memory_space<vmem>>, vector<1x8x512xf32>
    %165 = vector.shape_cast %164 : vector<1x8x512xf32> to vector<8x512xf32>
    %166 = arith.addf %161, %165 : vector<8x512xf32>
    %167 = vector.extract_strided_slice %166 {offsets = [0, 0], sizes = [8, 384], strides = [1, 1]} : vector<8x512xf32> to vector<8x384xf32>
    %cst_57 = arith.constant 5.000000e-01 : f32
    %168 = vector.broadcast %cst_57 : f32 to vector<8x384xf32>
    %169 = arith.mulf %168, %167 : vector<8x384xf32>
    %170 = math.tanh %169 : vector<8x384xf32>
    %cst_58 = arith.constant 5.000000e-01 : f32
    %171 = vector.broadcast %cst_58 : f32 to vector<8x384xf32>
    %172 = arith.mulf %171, %170 : vector<8x384xf32>
    %cst_59 = arith.constant 5.000000e-01 : f32
    %173 = vector.broadcast %cst_59 : f32 to vector<8x384xf32>
    %174 = arith.addf %172, %173 : vector<8x384xf32>
    %175 = vector.extract_strided_slice %166 {offsets = [0, 384], sizes = [8, 128], strides = [1, 1]} : vector<8x512xf32> to vector<8x128xf32>
    %176 = math.tanh %175 : vector<8x128xf32>
    %177 = vector.extract_strided_slice %174 {offsets = [0, 0], sizes = [8, 128], strides = [1, 1]} : vector<8x384xf32> to vector<8x128xf32>
    %178 = vector.extract_strided_slice %174 {offsets = [0, 128], sizes = [8, 128], strides = [1, 1]} : vector<8x384xf32> to vector<8x128xf32>
    %179 = vector.extract_strided_slice %174 {offsets = [0, 256], sizes = [8, 128], strides = [1, 1]} : vector<8x384xf32> to vector<8x128xf32>
    %180 = arith.mulf %178, %157 : vector<8x128xf32>
    %181 = arith.mulf %177, %176 : vector<8x128xf32>
    %182 = arith.addf %180, %181 : vector<8x128xf32>
    %183 = math.tanh %182 : vector<8x128xf32>
    %184 = arith.mulf %179, %183 : vector<8x128xf32>
    %c6_i32 = arith.constant 6 : i32
    %185 = arith.truncf %184 : vector<8x128xf32> to vector<8x128xbf16>
    %cst_60 = arith.constant dense<0.000000e+00> : vector<8x512xf32>
    %186 = tpu.matmul %185, %6, %cst_60 {dimension_numbers = #tpu.dot_dimension_numbers<[1], [0], [0], [1], [0, 0, 1, 1], [], []>} : vector<8x128xbf16>, vector<128x512xbf16>, vector<8x512xf32> -> vector<8x512xf32>
    %c1_i32_61 = arith.constant 1 : i32
    %187 = arith.addi %c6_i32, %c1_i32_61 : i32
    %188 = arith.index_cast %187 : i32 to index
    %c0_62 = arith.constant 0 : index
    %c0_63 = arith.constant 0 : index
    %189 = vector.load %arg6[%188, %c0_62, %c0_63] : memref<8x8x512xf32, #tpu.memory_space<vmem>>, vector<1x8x512xf32>
    %190 = vector.shape_cast %189 : vector<1x8x512xf32> to vector<8x512xf32>
    %191 = arith.addf %186, %190 : vector<8x512xf32>
    %192 = vector.extract_strided_slice %191 {offsets = [0, 0], sizes = [8, 384], strides = [1, 1]} : vector<8x512xf32> to vector<8x384xf32>
    %cst_64 = arith.constant 5.000000e-01 : f32
    %193 = vector.broadcast %cst_64 : f32 to vector<8x384xf32>
    %194 = arith.mulf %193, %192 : vector<8x384xf32>
    %195 = math.tanh %194 : vector<8x384xf32>
    %cst_65 = arith.constant 5.000000e-01 : f32
    %196 = vector.broadcast %cst_65 : f32 to vector<8x384xf32>
    %197 = arith.mulf %196, %195 : vector<8x384xf32>
    %cst_66 = arith.constant 5.000000e-01 : f32
    %198 = vector.broadcast %cst_66 : f32 to vector<8x384xf32>
    %199 = arith.addf %197, %198 : vector<8x384xf32>
    %200 = vector.extract_strided_slice %191 {offsets = [0, 384], sizes = [8, 128], strides = [1, 1]} : vector<8x512xf32> to vector<8x128xf32>
    %201 = math.tanh %200 : vector<8x128xf32>
    %202 = vector.extract_strided_slice %199 {offsets = [0, 0], sizes = [8, 128], strides = [1, 1]} : vector<8x384xf32> to vector<8x128xf32>
    %203 = vector.extract_strided_slice %199 {offsets = [0, 128], sizes = [8, 128], strides = [1, 1]} : vector<8x384xf32> to vector<8x128xf32>
    %204 = vector.extract_strided_slice %199 {offsets = [0, 256], sizes = [8, 128], strides = [1, 1]} : vector<8x384xf32> to vector<8x128xf32>
    %205 = arith.mulf %203, %182 : vector<8x128xf32>
    %206 = arith.mulf %202, %201 : vector<8x128xf32>
    %207 = arith.addf %205, %206 : vector<8x128xf32>
    %208 = math.tanh %207 : vector<8x128xf32>
    %209 = arith.mulf %204, %208 : vector<8x128xf32>
    %c7_i32 = arith.constant 7 : i32
    %210 = arith.truncf %209 : vector<8x128xf32> to vector<8x128xbf16>
    %cst_67 = arith.constant dense<0.000000e+00> : vector<8x512xf32>
    %211 = tpu.matmul %210, %6, %cst_67 {dimension_numbers = #tpu.dot_dimension_numbers<[1], [0], [0], [1], [0, 0, 1, 1], [], []>} : vector<8x128xbf16>, vector<128x512xbf16>, vector<8x512xf32> -> vector<8x512xf32>
    %c0_68 = arith.constant 0 : index
    %c0_69 = arith.constant 0 : index
    %c0_70 = arith.constant 0 : index
    %212 = vector.load %arg6[%c0_68, %c0_69, %c0_70] : memref<8x8x512xf32, #tpu.memory_space<vmem>>, vector<1x8x512xf32>
    %213 = vector.shape_cast %212 : vector<1x8x512xf32> to vector<8x512xf32>
    %214 = arith.addf %211, %213 : vector<8x512xf32>
    %215 = vector.extract_strided_slice %214 {offsets = [0, 0], sizes = [8, 384], strides = [1, 1]} : vector<8x512xf32> to vector<8x384xf32>
    %cst_71 = arith.constant 5.000000e-01 : f32
    %216 = vector.broadcast %cst_71 : f32 to vector<8x384xf32>
    %217 = arith.mulf %216, %215 : vector<8x384xf32>
    %218 = math.tanh %217 : vector<8x384xf32>
    %cst_72 = arith.constant 5.000000e-01 : f32
    %219 = vector.broadcast %cst_72 : f32 to vector<8x384xf32>
    %220 = arith.mulf %219, %218 : vector<8x384xf32>
    %cst_73 = arith.constant 5.000000e-01 : f32
    %221 = vector.broadcast %cst_73 : f32 to vector<8x384xf32>
    %222 = arith.addf %220, %221 : vector<8x384xf32>
    %223 = vector.extract_strided_slice %214 {offsets = [0, 384], sizes = [8, 128], strides = [1, 1]} : vector<8x512xf32> to vector<8x128xf32>
    %224 = math.tanh %223 : vector<8x128xf32>
    %225 = vector.extract_strided_slice %222 {offsets = [0, 0], sizes = [8, 128], strides = [1, 1]} : vector<8x384xf32> to vector<8x128xf32>
    %226 = vector.extract_strided_slice %222 {offsets = [0, 128], sizes = [8, 128], strides = [1, 1]} : vector<8x384xf32> to vector<8x128xf32>
    %227 = vector.extract_strided_slice %222 {offsets = [0, 256], sizes = [8, 128], strides = [1, 1]} : vector<8x384xf32> to vector<8x128xf32>
    %228 = arith.mulf %226, %207 : vector<8x128xf32>
    %229 = arith.mulf %225, %224 : vector<8x128xf32>
    %230 = arith.addf %228, %229 : vector<8x128xf32>
    %231 = math.tanh %230 : vector<8x128xf32>
    %232 = arith.mulf %227, %231 : vector<8x128xf32>
    %c0_74 = arith.constant 0 : index
    %c0_75 = arith.constant 0 : index
    %233 = vector.load %arg4[%c0_74, %c0_75] : memref<136x128xf32, #tpu.memory_space<vmem>>, vector<128x128xf32>
    %cst_76 = arith.constant dense<0.000000e+00> : vector<8x128xf32>
    %234 = tpu.matmul %232, %233, %cst_76 {dimension_numbers = #tpu.dot_dimension_numbers<[1], [0], [0], [1], [0, 0, 1, 1], [], []>} : vector<8x128xf32>, vector<128x128xf32>, vector<8x128xf32> -> vector<8x128xf32>
    %c128 = arith.constant 128 : index
    %c0_77 = arith.constant 0 : index
    %235 = vector.load %arg4[%c128, %c0_77] : memref<136x128xf32, #tpu.memory_space<vmem>>, vector<1x128xf32>
    %236 = vector.broadcast %235 : vector<1x128xf32> to vector<8x128xf32>
    %237 = arith.addf %234, %236 : vector<8x128xf32>
    %c0_78 = arith.constant 0 : index
    %c0_79 = arith.constant 0 : index
    %238 = vector.load %arg5[%c0_78, %c0_79] : memref<8x128xf32, #tpu.memory_space<vmem>>, vector<8x128xf32>
    tpu.vector_store %arg5[%c0_78, %c0_79], %237 {strides = array<i32>} : memref<8x128xf32, #tpu.memory_space<vmem>>, vector<8x128xf32>,
    return
  }
  func.func @transform_0(%arg0: i32) -> (i32, i32, i32) {
    %c0_i32 = arith.constant 0 : i32
    %c0_i32_0 = arith.constant 0 : i32
    %c0_i32_1 = arith.constant 0 : i32
    return %c0_i32, %arg0, %c0_i32_0 : i32, i32, i32
  }
  func.func @transform_1(%arg0: i32) -> (i32, i32) {
    %c0_i32 = arith.constant 0 : i32
    %c0_i32_0 = arith.constant 0 : i32
    %c0_i32_1 = arith.constant 0 : i32
    return %c0_i32, %c0_i32_0 : i32, i32
  }
  func.func @transform_2(%arg0: i32) -> (i32, i32) {
    %c0_i32 = arith.constant 0 : i32
    %c0_i32_0 = arith.constant 0 : i32
    %c0_i32_1 = arith.constant 0 : i32
    return %c0_i32, %c0_i32_0 : i32, i32
  }
  func.func @transform_3(%arg0: i32) -> (i32, i32) {
    %c0_i32 = arith.constant 0 : i32
    %c0_i32_0 = arith.constant 0 : i32
    %c0_i32_1 = arith.constant 0 : i32
    return %c0_i32, %c0_i32_0 : i32, i32
  }
  func.func @transform_4(%arg0: i32) -> (i32, i32) {
    %c0_i32 = arith.constant 0 : i32
    %c0_i32_0 = arith.constant 0 : i32
    return %arg0, %c0_i32 : i32, i32
  }
}

</mosaic_0001>

<bundles_post_ra>
// kernel: tpu_custom_call.1
= control target key start
LH: loop header
LB: loop body
LE: loop exit
PB: predicated region body
PF: predicated region fallthrough
CT: control target
= control target key end

     0   :  { %9 = vsyncpa [#allocation4], 0  ;;  %s2486_s0 = inlined_call_operand.hbm [shape: f32[8,8,8], index: 0, kind: input, shape index: {}]   ;;  %s2487_s1 = inlined_call_operand.hbm [shape: f32[8,512], index: 1, kind: input, shape index: {}]   ;;  %s2488_s2 = inlined_call_operand.hbm [shape: bf16[128,512], index: 2, kind: input, shape index: {}]   ;;  %s2489_s3 = inlined_call_operand.hbm [shape: f32[136,128], index: 3, kind: input, shape index: {}]   ;;  %s2490_s4 = inlined_call_operand.hbm [shape: f32[8,128], index: 4, kind: output, shape index: {}]  }
   0x1   :  { %10 = vsyncpa [#allocation7], 0 }
   0x2   :  { %11 = vsyncpa [#allocation10], 0 }
   0x3   :  { %12 = vsyncpa [#allocation5], 0  ;;  %s1935_s15 = smov [#allocation6]   ;;  %s1936_s17 = smov [#allocation3]  }
   0x4   :  { %s31_s16 = sshll.u32 %s1935_s15, 4  ;;  %s18_s18 = sshll.u32 %s1936_s17, 4  ;;  %s32_s16 = int_to_ptr.vmem [resolvable:$true] %s31_s16  ;;  %s19_s18 = int_to_ptr.vmem [resolvable:$true] %s18_s18 }
   0x5   :  { %s1835_s19 = scalar_lea.vmem %s32_s16, 512  ;;  %p1840_p1 = scmp.lt.s32.totalorder %s32_s16, %s32_s16 }
   0x6   :  { %p1836_p0 = scmp.ne.s32.totalorder %s32_s16, %s1835_s19  ;;  %p1841_p2 = scmp.lt.s32.totalorder %s1835_s19, %s1835_s19 }
   0x8   :  { %p1842_p3 = por %p1841_p2, %p1840_p1 }
   0xa   :  { %p1843_p4 = pnand %p1842_p3, %p1836_p0 }
   0xc   :  { %1846 = shalt.err (!%p1843_p4)
}
   0xd   :  { %34 = dma.hbm_to_vmem [thread:$0]  %s2487_s1, 512, %s32_s16, [#allocation7]  }
   0xe   :  { %s1855_s22 = scalar_lea.vmem %s19_s18, 1024  ;;  %p1860_p6 = scmp.lt.s32.totalorder %s19_s18, %s19_s18 }
   0xf   :  { %p1856_p5 = scmp.ne.s32.totalorder %s19_s18, %s1855_s22  ;;  %p1861_p7 = scmp.lt.s32.totalorder %s1855_s22, %s1855_s22 }
  0x11   :  { %p1862_p8 = por %p1861_p7, %p1860_p6 }
  0x13   :  { %p1863_p9 = pnand %p1862_p8, %p1856_p5 }
  0x15   :  { %1866 = shalt.err (!%p1863_p9)
}
  0x16   :  { %s1937_s23 = smov 128   ;;  %s1938_s24 = smov 8  }
  0x17   :  { %24 = dma.hbm_to_vmem [thread:$0]  %s2486_s0, 1024, %s19_s18, [#allocation4], %s1937_s23, %s1937_s23, %s1938_s24  }
  0x18   :  { %s1939_s27 = smov [#allocation8]  }
  0x19   :  { %s40_s28 = sshll.u32 %s1939_s27, 4  ;;  %s41_s28 = int_to_ptr.vmem [resolvable:$true] %s40_s28 }
  0x1a   :  { %s1875_s29 = scalar_lea.vmem %s41_s28, 4096  ;;  %p1880_p11 = scmp.lt.s32.totalorder %s41_s28, %s41_s28 }
  0x1b   :  { %p1876_p10 = scmp.ne.s32.totalorder %s41_s28, %s1875_s29  ;;  %p1881_p12 = scmp.lt.s32.totalorder %s1875_s29, %s1875_s29 }
  0x1d   :  { %p1882_p13 = por %p1881_p12, %p1880_p11 }
  0x1f   :  { %p1883_p0 = pnand %p1882_p13, %p1876_p10 }
  0x21   :  { %1886 = shalt.err (!%p1883_p0)
}
  0x22   :  { %s1940_s1 = smov 256   ;;  %s1941_s30 = smov 16  }
  0x23   :  { %46 = dma.hbm_to_vmem [thread:$0]  %s2488_s2, 4096, %s41_s28, [#allocation7], %s1940_s1, %s1940_s1, %s1941_s30  }
  0x24   :  { %s1942_s7 = smov [#allocation9]  }
  0x25   :  { %s52_s8 = sshll.u32 %s1942_s7, 4  ;;  %s53_s8 = int_to_ptr.vmem [resolvable:$true] %s52_s8 }
  0x26   :  { %s1895_s0 = scalar_lea.vmem %s53_s8, 2176  ;;  %p1900_p2 = scmp.lt.s32.totalorder %s53_s8, %s53_s8 }
  0x27   :  { %p1896_p1 = scmp.ne.s32.totalorder %s53_s8, %s1895_s0  ;;  %p1901_p3 = scmp.lt.s32.totalorder %s1895_s0, %s1895_s0 }
  0x29   :  { %p1902_p4 = por %p1901_p3, %p1900_p2 }
  0x2b   :  { %p1903_p5 = pnand %p1902_p4, %p1896_p1 }
  0x2d   :  { %1906 = shalt.err (!%p1903_p5)
}
  0x2e   :  { %58 = dma.hbm_to_vmem [thread:$0]  %s2489_s3, 2176, %s53_s8, [#allocation10], %s1937_s23, %s1937_s23, %s1938_s24  }
  0x2f   :  { %1927 = dma.done.wait [#allocation4], 1024  }
  0x30   :  { %1928 = vsyncadd [#allocation4], 4294966272 }
  0x31   :  { %1929 = dma.done.wait [#allocation7], 4608  }
  0x32   :  { %1930 = vsyncadd [#allocation7], 4294962688 }
  0x33   :  { %1931 = dma.done.wait [#allocation10], 2176  }
  0x34   :  { %1932 = vsyncadd [#allocation10], 4294965120  ;;  %v2491_v0 = vmov 0.0   ;;  %v81_v1 = vld [vmem:[#allocation6 + $0x8] sm:$0xff]  ;;  %v80_v2 = vld [vmem:[#allocation6] sm:$0xff]  ;;  %vm84_vm0 = vcmask 64512  }
  0x35   :  { %173 = vmatprep.mubr.f32.mxu0 %v2491_v0  ;;  %286 = vmatprep.mubr.f32.mxu1 %v2491_v0  ;;  %v72_v3 = vld [vmem:[#allocation3] sm:$0xff]  ;;  %v83_v4 = vld [vmem:[#allocation6 + $0x18] sm:$0xff]  ;;  %v82_v5 = vld [vmem:[#allocation6 + $0x10] sm:$0xff]  ;;  %v2493_v45 = vmov 0   ;;  %vm1945_vm3 = vmmov 0   ;;  %s1946_s2 = smov [#allocation11]  }
  0x36   :  { %139 = vmatprep.subr.mxu0 %v81_v1  ;;  %252 = vmatprep.subr.mxu1 %v83_v4  ;;  %v1990_v6 = vld [vmem:[#allocation8 + $0xe4] ss:$16 sps:$4 sm:$0xff]   ;;  %v1992_v7 = vld [vmem:[#allocation8 + $0xec] ss:$16 sps:$4 sm:$0xff]   ;;  %v1994_v8 = vld [vmem:[#allocation8 + $0xe0] ss:$16 sps:$4 sm:$0xff]   ;;  %v421_v1 = vlaneseq }
  0x37   :  { %140 = vmatpush1.msra.mxu0 %v80_v2  ;;  %253 = vmatpush1.msra.mxu1 %v82_v5  ;;  %v1996_v9 = vld [vmem:[#allocation8 + $0xe8] ss:$16 sps:$4 sm:$0xff]   ;;  %v2003_v11 = vld [vmem:[#allocation8 + $0xc4] ss:$16 sps:$4 sm:$0xff]   ;;  %v2006_v12 = vld [vmem:[#allocation8 + $0xcc] ss:$16 sps:$4 sm:$0xff]  }
  0x38   :  { %1538 = vmatmul.mubr.msk.f32.vlgmr.msra.gmra.mxu0 %vm84_vm0, %v72_v3  ;;  %1546 = vmatmul.mubr.msk.f32.vlgmr.msra.gmra.mxu1 %vm84_vm0, %v72_v3  ;;  %v73_v10 = vld [vmem:[#allocation3 + $0x8] sm:$0xff]  ;;  %v2008_v13 = vld [vmem:[#allocation8 + $0xc0] ss:$16 sps:$4 sm:$0xff]   ;;  %v2019_v16 = vld [vmem:[#allocation8 + $0xa4] ss:$16 sps:$4 sm:$0xff]   ;;  %v2131_v3 = vand.u32 127, %v421_v1 }
  0x39   :  { %179 = vmatprep.mubr.f32.mxu0 %v2491_v0  ;;  %292 = vmatprep.mubr.f32.mxu1 %v2491_v0  ;;  %v2011_v14 = vld [vmem:[#allocation8 + $0xc8] ss:$16 sps:$4 sm:$0xff]   ;;  %v74_v15 = vld [vmem:[#allocation3 + $0x10] sm:$0xff]  ;;  %v2022_v17 = vld [vmem:[#allocation8 + $0xac] ss:$16 sps:$4 sm:$0xff]   ;;  %s1527_s3 = sshll.u32 %s1946_s2, 4  ;;  %s1528_s3 = int_to_ptr.vmem [resolvable:$true] %s1527_s3 }
  0x3a   :  { %592 = vmatprep.subr.bf16.mxu0 %v1990_v6  ;;  %633 = vmatprep.subr.bf16.mxu1 %v1992_v7  ;;  %v2024_v18 = vld [vmem:[#allocation8 + $0xa0] ss:$16 sps:$4 sm:$0xff]   ;;  %v2027_v19 = vld [vmem:[#allocation8 + $0xa8] ss:$16 sps:$4 sm:$0xff]   ;;  %v2035_v21 = vld [vmem:[#allocation8 + $0x84] ss:$16 sps:$4 sm:$0xff]   ;;  %p1912_p7 = scmp.lt.s32.totalorder %s1528_s3, %s1528_s3 }
  0x3b   :  { %593 = vmatpush1.bf16.msra.mxu0 %v1994_v8  ;;  %634 = vmatpush1.bf16.msra.mxu1 %v1996_v9  ;;  %v75_v20 = vld [vmem:[#allocation3 + $0x18] sm:$0xff]  ;;  %v2040_v23 = vld [vmem:[#allocation8 + $0x80] ss:$16 sps:$4 sm:$0xff]   ;;  %v2051_v26 = vld [vmem:[#allocation8 + $0x64] ss:$16 sps:$4 sm:$0xff]   ;;  %vm423_vm1 = vcmp.lt.s32.totalorder %v2131_v3, 64 }
  0x3c   :  { %1539 = vmatmul.mubr.msk.f32.gmra.mxu0 %vm84_vm0, %v73_v10  ;;  %1547 = vmatmul.mubr.msk.f32.gmra.mxu1 %vm84_vm0, %v73_v10  ;;  %v2038_v22 = vld [vmem:[#allocation8 + $0x8c] ss:$16 sps:$4 sm:$0xff]   ;;  %v2043_v24 = vld [vmem:[#allocation8 + $0x88] ss:$16 sps:$4 sm:$0xff]   ;;  %v76_v25 = vld [vmem:[#allocation3 + $0x20] sm:$0xff]  ;;  %s1907_s11 = scalar_lea.vmem %s1528_s3, 128 }
  0x3d   :  { %185 = vmatprep.mubr.f32.mxu0 %v2491_v0  ;;  %298 = vmatprep.mubr.f32.mxu1 %v2491_v0  ;;  %v2054_v27 = vld [vmem:[#allocation8 + $0x60] ss:$16 sps:$4 sm:$0xff]   ;;  %v2056_v28 = vld [vmem:[#allocation8 + $0x6c] ss:$16 sps:$4 sm:$0xff]   ;;  %v2059_v29 = vld [vmem:[#allocation8 + $0x68] ss:$16 sps:$4 sm:$0xff]   ;;  %p1908_p6 = scmp.ne.s32.totalorder %s1528_s3, %s1907_s11  ;;  %p1913_p8 = scmp.lt.s32.totalorder %s1907_s11, %s1907_s11 }
  0x3e   :  { %594 = vmatprep.subr.bf16.mxu0 %v2003_v11  ;;  %635 = vmatprep.subr.bf16.mxu1 %v2006_v12  ;;  %v77_v30 = vld [vmem:[#allocation3 + $0x28] sm:$0xff]  ;;  %v2062_v31 = vld [vmem:[#allocation8 + $0x44] ss:$16 sps:$4 sm:$0xff]   ;;  %v2070_v33 = vld [vmem:[#allocation8 + $0x40] ss:$16 sps:$4 sm:$0xff]  }
  0x3f   :  { %595 = vmatpush1.bf16.msra.mxu0 %v2008_v13  ;;  %636 = vmatpush1.bf16.msra.mxu1 %v2011_v14  ;;  %v2066_v32 = vld [vmem:[#allocation8 + $0x4c] ss:$16 sps:$4 sm:$0xff]   ;;  %v2072_v34 = vld [vmem:[#allocation8 + $0x48] ss:$16 sps:$4 sm:$0xff]   ;;  %v2076_v35 = vld [vmem:[#allocation8 + $0x24] ss:$16 sps:$4 sm:$0xff]   ;;  %p1914_p9 = por %p1913_p8, %p1912_p7 }
  0x40   :  { %1540 = vmatmul.mubr.msk.f32.gmra.mxu0 %vm84_vm0, %v74_v15  ;;  %1548 = vmatmul.mubr.msk.f32.gmra.mxu1 %vm84_vm0, %v74_v15  ;;  %v78_v36 = vld [vmem:[#allocation3 + $0x30] sm:$0xff]  ;;  %v2080_v37 = vld [vmem:[#allocation8 + $0x2c] ss:$16 sps:$4 sm:$0xff]   ;;  %v2088_v39 = vld [vmem:[#allocation8 + $0x28] ss:$16 sps:$4 sm:$0xff]  }
  0x41   :  { %191 = vmatprep.mubr.f32.mxu0 %v2491_v0  ;;  %304 = vmatprep.mubr.f32.mxu1 %v2491_v0  ;;  %v2086_v38 = vld [vmem:[#allocation8 + $0x20] ss:$16 sps:$4 sm:$0xff]   ;;  %v2092_v40 = vld [vmem:[#allocation8 + $0x4] ss:$16 sps:$4 sm:$0xff]   ;;  %v79_v41 = vld [vmem:[#allocation3 + $0x38] sm:$0xff]  ;;  %p1915_p10 = pnand %p1914_p9, %p1908_p6 }
  0x42   :  { %596 = vmatprep.subr.bf16.mxu0 %v2019_v16  ;;  %637 = vmatprep.subr.bf16.mxu1 %v2022_v17  ;;  %v2096_v42 = vld [vmem:[#allocation8 + $0xc] ss:$16 sps:$4 sm:$0xff]   ;;  %v2102_v43 = vld [vmem:[#allocation8] ss:$16 sps:$4 sm:$0xff]   ;;  %v2104_v44 = vld [vmem:[#allocation8 + $0x8] ss:$16 sps:$4 sm:$0xff]  }
  0x43   :  { %597 = vmatpush1.bf16.msra.mxu0 %v2024_v18  ;;  %638 = vmatpush1.bf16.msra.mxu1 %v2027_v19  ;;  %vm1586_vm2 = vmpackc.low %vm423_vm1, %vm423_vm1 }
  0x44   :  { %1541 = vmatmul.mubr.msk.f32.gmra.mxu0 %vm84_vm0, %v75_v20  ;;  %1549 = vmatmul.mubr.msk.f32.gmra.mxu1 %vm84_vm0, %v75_v20 }
  0x45   :  { %197 = vmatprep.mubr.f32.mxu0 %v2491_v0  ;;  %310 = vmatprep.mubr.f32.mxu1 %v2491_v0 }
  0x46   :  { %598 = vmatprep.subr.bf16.mxu0 %v2035_v21  ;;  %639 = vmatprep.subr.bf16.mxu1 %v2038_v22 }
  0x47   :  { %599 = vmatpush1.bf16.msra.mxu0 %v2040_v23  ;;  %640 = vmatpush1.bf16.msra.mxu1 %v2043_v24 }
  0x48   :  { %1542 = vmatmul.mubr.msk.f32.gmra.mxu0 %vm84_vm0, %v76_v25  ;;  %1550 = vmatmul.mubr.msk.f32.gmra.mxu1 %vm84_vm0, %v76_v25 }
  0x49   :  { %203 = vmatprep.mubr.f32.mxu0 %v2491_v0  ;;  %316 = vmatprep.mubr.f32.mxu1 %v2491_v0 }
  0x4a   :  { %600 = vmatprep.subr.bf16.mxu0 %v2051_v26  ;;  %641 = vmatprep.subr.bf16.mxu1 %v2056_v28 }
  0x4b   :  { %601 = vmatpush1.bf16.msra.mxu0 %v2054_v27  ;;  %642 = vmatpush1.bf16.msra.mxu1 %v2059_v29 }
  0x4c   :  { %1543 = vmatmul.mubr.msk.f32.gmra.mxu0 %vm84_vm0, %v77_v30  ;;  %602 = vmatprep.subr.bf16.mxu0 %v2062_v31 }
  0x4d   :  { %1551 = vmatmul.mubr.msk.f32.gmra.mxu1 %vm84_vm0, %v77_v30  ;;  %643 = vmatprep.subr.bf16.mxu1 %v2066_v32 }
  0x4e   :  { %209 = vmatprep.mubr.f32.mxu0 %v2491_v0  ;;  %322 = vmatprep.mubr.f32.mxu1 %v2491_v0 }
  0x4f   :  { %603 = vmatpush1.bf16.msra.mxu0 %v2070_v33  ;;  %644 = vmatpush1.bf16.msra.mxu1 %v2072_v34 }
  0x50   :  { %1544 = vmatmul.mubr.msk.f32.gmra.mxu0 %vm84_vm0, %v78_v36  ;;  %604 = vmatprep.subr.bf16.mxu0 %v2076_v35 }
  0x51   :  { %1552 = vmatmul.mubr.msk.f32.gmra.mxu1 %vm84_vm0, %v78_v36  ;;  %645 = vmatprep.subr.bf16.mxu1 %v2080_v37 }
  0x52   :  { %215 = vmatprep.mubr.f32.mxu0 %v2491_v0  ;;  %328 = vmatprep.mubr.f32.mxu1 %v2491_v0 }
  0x53   :  { %605 = vmatpush1.bf16.msra.mxu0 %v2086_v38  ;;  %646 = vmatpush1.bf16.msra.mxu1 %v2088_v39 }
  0x54   :  { %1545 = vmatmul.mubr.msk.f32.gmra.mxu0 %vm84_vm0, %v79_v41  ;;  %606 = vmatprep.subr.bf16.mxu0 %v2092_v40 }
  0x55   :  { %1553 = vmatmul.mubr.msk.f32.gmra.mxu1 %vm84_vm0, %v79_v41  ;;  %647 = vmatprep.subr.bf16.mxu1 %v2096_v42 }
  0x56   :  { %624 = vmatprep.mubr.bf16.mxu0 %v2493_v45  ;;  %665 = vmatprep.mubr.bf16.mxu1 %v2493_v45 }
  0x57   :  { %607 = vmatpush1.bf16.msra.mxu0 %v2102_v43  ;;  %648 = vmatpush1.bf16.msra.mxu1 %v2104_v44 }
  0x58   :  { %698 = vmatprep.subr.bf16.mxu0 %v1990_v6  ;;  %739 = vmatprep.subr.bf16.mxu1 %v1992_v7 }
  0xf8   :  { %v2116_v46 = vpop.f32.mrf.mxu0  ;;  %v2119_v48 = vpop.f32.mrf.mxu1 }
  0xf9   :  { %2499 = vst [vmem:[#allocation16_spill] sm:$0xff] %v2116_v46  ;;  %v403_v47 = vmul.f32 0.5, %v2116_v46  ;;  %2500 = vst [vmem:[#allocation17_spill] sm:$0xff] %v2119_v48  ;;  %v405_v52 = vmul.f32 0.5, %v2119_v48 }
  0xfa   :  { %v2121_v49 = vpop.f32.mrf.mxu0  ;;  %v2124_v51 = vpop.f32.mrf.mxu1 }
  0xfb   :  { %2501 = vst [vmem:[#allocation18_spill] sm:$0xff] %v2121_v49  ;;  %1705 = vtanh.f32 %v403_v47  ;;  %v404_v50 = vmul.f32 0.5, %v2121_v49  ;;  %2502 = vst [vmem:[#allocation19_spill] sm:$0xff] %v2124_v51 }
  0xfc   :  { %v294_v20 = vpop.f32.mrf.mxu1  ;;  %v181_v25 = vpop.f32.mrf.mxu0 }
  0xfd   :  { %1707 = vtanh.f32 %v404_v50 }
  0xfe   :  { %1709 = vtanh.f32 %v2124_v51  ;;  %v296_v30 = vpop.f32.mrf.mxu1  ;;  %v183_v36 = vpop.f32.mrf.mxu0 }
  0xff   :  { %1711 = vtanh.f32 %v405_v52 }
 0x100   :  { %v2171_v41 = vpop.f32.mrf.mxu1  ;;  %v2173_v47 = vpop.f32.mrf.mxu0 }
 0x102   :  { %v2175_v50 = vpop.f32.mrf.mxu1  ;;  %v2177_v52 = vpop.f32.mrf.mxu0 }
 0x108   :  { %v1706_v53 = vpop.eup %1705 }
 0x109   :  { %v409_v54 = vmul.f32 0.5, %v1706_v53  ;;  %v2179_v53 = vpop.f32.mrf.mxu1 }
 0x10a   :  { %v1708_v55 = vpop.eup %1707  ;;  %2503 = vst [vmem:[#allocation20_spill] sm:$0xff] %v2179_v53 }
 0x10b   :  { %v412_v56 = vadd.f32 0.5, %v409_v54  ;;  %v410_v57 = vmul.f32 0.5, %v1708_v55  ;;  %v1710_v58 = vpop.eup %1709  ;;  %v2181_v54 = vpop.f32.mrf.mxu0 }
 0x10c   :  { %v1712_v63 = vpop.eup %1711  ;;  %v2183_v55 = vpop.f32.mrf.mxu1 }
 0x10d   :  { %v413_v59 = vadd.f32 0.5, %v410_v57  ;;  %v417_v61 = vmul.f32 %v1710_v58, %v412_v56  ;;  %v411_v2 = vmul.f32 0.5, %v1712_v63  ;;  %v2185_v56 = vpop.f32.mrf.mxu0 }
 0x10e   :  { %v2187_v57 = vpop.f32.mrf.mxu1 }
 0x10f   :  { %v416_v60 = vmul.f32 0.0, %v413_v59  ;;  %v414_v4 = vadd.f32 0.5, %v411_v2  ;;  %2504 = vst [vmem:[#allocation21_spill] sm:$0xff] %v2187_v57  ;;  %v2189_v58 = vpop.f32.mrf.mxu0 }
 0x110   :  { %2505 = vst [vmem:[#allocation22_spill] sm:$0xff] %v2189_v58  ;;  %v2191_v59 = vpop.f32.mrf.mxu1 }
 0x111   :  { %v2128_v62 = vadd.f32 %v417_v61, %v416_v60  ;;  %2506 = vst [vmem:[#allocation23_spill] sm:$0xff] %v2191_v59  ;;  %v2193_v60 = vpop.f32.mrf.mxu0 }
 0x112   :  { %2507 = vst [vmem:[#allocation24_spill] sm:$0xff] %v2193_v60  ;;  %v2195_v61 = vpop.f32.mrf.mxu1 }
 0x113   :  { %1713 = vtanh.f32 %v2128_v62  ;;  %2508 = vst [vmem:[#allocation25_spill] sm:$0xff] %v2195_v61  ;;  %v2197_v63 = vpop.f32.mrf.mxu0 }
 0x114   :  { %2509 = vst [vmem:[#allocation26_spill] sm:$0xff] %v2197_v63  ;;  %v2199_v1 = vpop.f32.mrf.mxu1 }
 0x115   :  { %2510 = vst [vmem:[#allocation27_spill] sm:$0xff] %v2199_v1  ;;  %v2201_v2 = vpop.f32.mrf.mxu0 }
 0x116   :  { %2511 = vst [vmem:[#allocation28_spill] sm:$0xff] %v2201_v2 }
 0x120   :  { %v1714_v5 = vpop.eup %1713 }
 0x121   :  { %v420_v10 = vmul.f32 %v1714_v5, %v414_v4  ;;  %v2203_v4 = vpop.f32.mrf.mxu1  ;;  %v2205_v5 = vpop.f32.mrf.mxu0 }
 0x122   :  { %2512 = vst [vmem:[#allocation29_spill] sm:$0xff] %v2203_v4  ;;  %2513 = vst [vmem:[#allocation30_spill] sm:$0xff] %v2205_v5 }
 0x123   :  { %v1587_v15 = vpack.c.bf16 %v420_v10, %v420_v10  ;;  %v2207_v10 = vpop.f32.mrf.mxu1 }
 0x124   :  { %2514 = vst [vmem:[#allocation31_spill] sm:$0xff] %v2207_v10 }
 0x125   :  { %1588 = vmatmul.mubr.msk.bf16.vlgmr.msra.gmra.mxu0 %vm1586_vm2, %v1587_v15  ;;  %1591 = vmatmul.mubr.msk.bf16.vlgmr.msra.gmra.mxu1 %vm1586_vm2, %v1587_v15  ;;  %v2209_v15 = vpop.f32.mrf.mxu0  ;;  %v2211_v0 = vpop.f32.mrf.mxu1 }
 0x126   :  { %699 = vmatpush1.bf16.msra.mxu0 %v1994_v8  ;;  %740 = vmatpush1.bf16.msra.mxu1 %v1996_v9  ;;  %2515 = vst [vmem:[#allocation32_spill] sm:$0xff] %v2209_v15  ;;  %2516 = vst [vmem:[#allocation33_spill] sm:$0xff] %v2211_v0 }
 0x127   :  { %700 = vmatprep.subr.bf16.mxu0 %v2003_v11  ;;  %741 = vmatprep.subr.bf16.mxu1 %v2006_v12  ;;  %v2215_v48 = vpop.f32.mrf.mxu1 }
 0x128   :  { %730 = vmatprep.mubr.bf16.mxu0 %v2493_v45  ;;  %771 = vmatprep.mubr.bf16.mxu1 %v2493_v45  ;;  %v2213_v45 = vpop.f32.mrf.mxu0  ;;  %2518 = vst [vmem:[#allocation35_spill] sm:$0xff] %v2215_v48 }
 0x129   :  { %2517 = vst [vmem:[#allocation34_spill] sm:$0xff] %v2213_v45 }
 0x12a   :  { %701 = vmatpush1.bf16.msra.mxu0 %v2008_v13  ;;  %742 = vmatpush1.bf16.msra.mxu1 %v2011_v14  ;;  %v2217_v51 = vpop.f32.mrf.mxu0 }
 0x12b   :  { %702 = vmatprep.subr.bf16.mxu0 %v2019_v16  ;;  %743 = vmatprep.subr.bf16.mxu1 %v2022_v17  ;;  %2519 = vst [vmem:[#allocation36_spill] sm:$0xff] %v2217_v51 }
 0x12e   :  { %703 = vmatpush1.bf16.msra.mxu0 %v2024_v18  ;;  %744 = vmatpush1.bf16.msra.mxu1 %v2027_v19 }
 0x12f   :  { %704 = vmatprep.subr.bf16.mxu0 %v2035_v21  ;;  %745 = vmatprep.subr.bf16.mxu1 %v2038_v22 }
 0x132   :  { %705 = vmatpush1.bf16.msra.mxu0 %v2040_v23  ;;  %746 = vmatpush1.bf16.msra.mxu1 %v2043_v24 }
 0x133   :  { %706 = vmatprep.subr.bf16.mxu0 %v2051_v26  ;;  %747 = vmatprep.subr.bf16.mxu1 %v2056_v28 }
 0x136   :  { %707 = vmatpush1.bf16.msra.mxu0 %v2054_v27  ;;  %748 = vmatpush1.bf16.msra.mxu1 %v2059_v29 }
 0x137   :  { %708 = vmatprep.subr.bf16.mxu0 %v2062_v31  ;;  %749 = vmatprep.subr.bf16.mxu1 %v2066_v32 }
 0x13a   :  { %709 = vmatpush1.bf16.msra.mxu0 %v2070_v33  ;;  %750 = vmatpush1.bf16.msra.mxu1 %v2072_v34 }
 0x13b   :  { %710 = vmatprep.subr.bf16.mxu0 %v2076_v35  ;;  %751 = vmatprep.subr.bf16.mxu1 %v2080_v37 }
 0x13e   :  { %711 = vmatpush1.bf16.msra.mxu0 %v2086_v38  ;;  %752 = vmatpush1.bf16.msra.mxu1 %v2088_v39 }
 0x13f   :  { %712 = vmatprep.subr.bf16.mxu0 %v2092_v40  ;;  %753 = vmatprep.subr.bf16.mxu1 %v2096_v42 }
 0x142   :  { %713 = vmatpush1.bf16.msra.mxu0 %v2102_v43  ;;  %754 = vmatpush1.bf16.msra.mxu1 %v2104_v44 }
 0x143   :  { %804 = vmatprep.subr.bf16.mxu0 %v1990_v6  ;;  %845 = vmatprep.subr.bf16.mxu1 %v1992_v7 }
 0x1e5   :  { %v626_v49 = vpop.f32.mrf.mxu0  ;;  %v667_v46 = vpop.f32.mrf.mxu1 }
 0x1e6   :  { %v627_v61 = vadd.f32 %v626_v49, %v181_v25  ;;  %v668_v45 = vadd.f32 %v667_v46, %v294_v20 }
 0x1e7   :  { %v628_v1 = vpop.f32.mrf.mxu0  ;;  %v669_v2 = vpop.f32.mrf.mxu1 }
 0x1e8   :  { %v674_v4 = vmul.f32 0.5, %v627_v61  ;;  %v629_v63 = vadd.f32 %v628_v1, %v183_v36  ;;  %v670_v0 = vadd.f32 %v669_v2, %v296_v30  ;;  %v676_v48 = vmul.f32 0.5, %v668_v45 }
 0x1e9   :  { %v630_v5 = vpop.f32.mrf.mxu0  ;;  %v671_v57 = vpop.f32.mrf.mxu1  ;;  %v425_v36 = vsel %vm423_vm1, %v2128_v62, 0.0 }
 0x1ea   :  { %1715 = vtanh.f32 %v674_v4  ;;  %v675_v10 = vmul.f32 0.5, %v629_v63 }
 0x1eb   :  { %v631_v15 = vpop.f32.mrf.mxu0  ;;  %v672_v59 = vpop.f32.mrf.mxu1 }
 0x1ec   :  { %1717 = vtanh.f32 %v675_v10 }
 0x1ed   :  { %1719 = vtanh.f32 %v670_v0 }
 0x1ee   :  { %1721 = vtanh.f32 %v676_v48  ;;  %v2520_v48 = vmov 0  }
 0x1f7   :  { %v1716_v60 = vpop.eup %1715 }
 0x1f8   :  { %v680_v51 = vmul.f32 0.5, %v1716_v60 }
 0x1f9   :  { %v1718_v58 = vpop.eup %1717 }
 0x1fa   :  { %v683_v53 = vadd.f32 0.5, %v680_v51  ;;  %v681_v49 = vmul.f32 0.5, %v1718_v58  ;;  %v1720_v61 = vpop.eup %1719 }
 0x1fb   :  { %v1722_v0 = vpop.eup %1721 }
 0x1fc   :  { %v684_v25 = vadd.f32 0.5, %v681_v49  ;;  %v688_v63 = vmul.f32 %v1720_v61, %v683_v53  ;;  %v682_v45 = vmul.f32 0.5, %v1722_v0 }
 0x1fe   :  { %v687_v57 = vmul.f32 %v684_v25, %v425_v36  ;;  %v685_v46 = vadd.f32 0.5, %v682_v45 }
 0x200   :  { %v2222_v59 = vadd.f32 %v688_v63, %v687_v57 }
 0x202   :  { %1723 = vtanh.f32 %v2222_v59 }
 0x20f   :  { %v1724_v20 = vpop.eup %1723 }
 0x210   :  { %v691_v30 = vmul.f32 %v1724_v20, %v685_v46 }
 0x212   :  { %v692_v51 = vpack.c.bf16 %v691_v30, %v691_v30 }
 0x214   :  { %731 = vmatmul.mubr.bf16.vlgmr.msra.gmra.mxu0 %v692_v51  ;;  %772 = vmatmul.mubr.bf16.vlgmr.msra.gmra.mxu1 %v692_v51 }
 0x215   :  { %805 = vmatpush1.bf16.msra.mxu0 %v1994_v8  ;;  %846 = vmatpush1.bf16.msra.mxu1 %v1996_v9 }
 0x216   :  { %806 = vmatprep.subr.bf16.mxu0 %v2003_v11  ;;  %847 = vmatprep.subr.bf16.mxu1 %v2006_v12 }
 0x217   :  { %836 = vmatprep.mubr.bf16.mxu0 %v2520_v48  ;;  %877 = vmatprep.mubr.bf16.mxu1 %v2520_v48 }
 0x219   :  { %807 = vmatpush1.bf16.msra.mxu0 %v2008_v13  ;;  %848 = vmatpush1.bf16.msra.mxu1 %v2011_v14 }
 0x21a   :  { %808 = vmatprep.subr.bf16.mxu0 %v2019_v16  ;;  %849 = vmatprep.subr.bf16.mxu1 %v2022_v17 }
 0x21d   :  { %809 = vmatpush1.bf16.msra.mxu0 %v2024_v18  ;;  %850 = vmatpush1.bf16.msra.mxu1 %v2027_v19 }
 0x21e   :  { %810 = vmatprep.subr.bf16.mxu0 %v2035_v21  ;;  %851 = vmatprep.subr.bf16.mxu1 %v2038_v22 }
 0x221   :  { %811 = vmatpush1.bf16.msra.mxu0 %v2040_v23  ;;  %852 = vmatpush1.bf16.msra.mxu1 %v2043_v24 }
 0x222   :  { %812 = vmatprep.subr.bf16.mxu0 %v2051_v26  ;;  %853 = vmatprep.subr.bf16.mxu1 %v2056_v28 }
 0x225   :  { %813 = vmatpush1.bf16.msra.mxu0 %v2054_v27  ;;  %854 = vmatpush1.bf16.msra.mxu1 %v2059_v29 }
 0x226   :  { %814 = vmatprep.subr.bf16.mxu0 %v2062_v31  ;;  %855 = vmatprep.subr.bf16.mxu1 %v2066_v32 }
 0x229   :  { %815 = vmatpush1.bf16.msra.mxu0 %v2070_v33  ;;  %856 = vmatpush1.bf16.msra.mxu1 %v2072_v34 }
 0x22a   :  { %816 = vmatprep.subr.bf16.mxu0 %v2076_v35  ;;  %857 = vmatprep.subr.bf16.mxu1 %v2080_v37 }
 0x22d   :  { %817 = vmatpush1.bf16.msra.mxu0 %v2086_v38  ;;  %858 = vmatpush1.bf16.msra.mxu1 %v2088_v39 }
 0x22e   :  { %818 = vmatprep.subr.bf16.mxu0 %v2092_v40  ;;  %859 = vmatprep.subr.bf16.mxu1 %v2096_v42 }
 0x231   :  { %819 = vmatpush1.bf16.msra.mxu0 %v2102_v43  ;;  %860 = vmatpush1.bf16.msra.mxu1 %v2104_v44 }
 0x232   :  { %910 = vmatprep.subr.bf16.mxu0 %v1990_v6  ;;  %951 = vmatprep.subr.bf16.mxu1 %v1992_v7 }
 0x2d4   :  { %v732_v62 = vpop.f32.mrf.mxu0  ;;  %v773_v3 = vpop.f32.mrf.mxu1 }
 0x2d5   :  { %v733_v53 = vadd.f32 %v732_v62, %v2173_v47  ;;  %v774_v61 = vadd.f32 %v773_v3, %v2171_v41 }
 0x2d6   :  { %v734_v58 = vpop.f32.mrf.mxu0  ;;  %v775_v60 = vpop.f32.mrf.mxu1 }
 0x2d7   :  { %v780_v1 = vmul.f32 0.5, %v733_v53  ;;  %v735_v2 = vadd.f32 %v734_v58, %v2177_v52  ;;  %v776_v25 = vadd.f32 %v775_v60, %v2175_v50  ;;  %v782_v36 = vmul.f32 0.5, %v774_v61 }
 0x2d8   :  { %v736_v4 = vpop.f32.mrf.mxu0  ;;  %v777_v5 = vpop.f32.mrf.mxu1 }
 0x2d9   :  { %1725 = vtanh.f32 %v780_v1  ;;  %v781_v10 = vmul.f32 0.5, %v735_v2 }
 0x2da   :  { %v737_v15 = vpop.f32.mrf.mxu0  ;;  %v778_v49 = vpop.f32.mrf.mxu1 }
 0x2db   :  { %1727 = vtanh.f32 %v781_v10 }
 0x2dc   :  { %1729 = vtanh.f32 %v776_v25 }
 0x2dd   :  { %1731 = vtanh.f32 %v782_v36 }
 0x2e6   :  { %v1726_v57 = vpop.eup %1725 }
 0x2e7   :  { %v786_v47 = vmul.f32 0.5, %v1726_v57 }
 0x2e8   :  { %v1728_v63 = vpop.eup %1727 }
 0x2e9   :  { %v789_v0 = vadd.f32 0.5, %v786_v47  ;;  %v787_v45 = vmul.f32 0.5, %v1728_v63  ;;  %v1730_v46 = vpop.eup %1729  ;;  %v2521_v47 = vld [vmem:[#allocation20_spill] sm:$0xff] }
 0x2ea   :  { %v1732_v50 = vpop.eup %1731 }
 0x2eb   :  { %v790_v52 = vadd.f32 0.5, %v787_v45  ;;  %v794_v30 = vmul.f32 %v1730_v46, %v789_v0  ;;  %v788_v62 = vmul.f32 0.5, %v1732_v50 }
 0x2ed   :  { %v793_v20 = vmul.f32 %v790_v52, %v2222_v59  ;;  %v791_v53 = vadd.f32 0.5, %v788_v62 }
 0x2ef   :  { %v2264_v51 = vadd.f32 %v794_v30, %v793_v20 }
 0x2f1   :  { %1733 = vtanh.f32 %v2264_v51 }
 0x2fe   :  { %v1734_v41 = vpop.eup %1733 }
 0x2ff   :  { %v797_v3 = vmul.f32 %v1734_v41, %v791_v53 }
 0x301   :  { %v798_v58 = vpack.c.bf16 %v797_v3, %v797_v3 }
 0x303   :  { %837 = vmatmul.mubr.bf16.vlgmr.msra.gmra.mxu0 %v798_v58  ;;  %878 = vmatmul.mubr.bf16.vlgmr.msra.gmra.mxu1 %v798_v58 }
 0x304   :  { %911 = vmatpush1.bf16.msra.mxu0 %v1994_v8  ;;  %952 = vmatpush1.bf16.msra.mxu1 %v1996_v9 }
 0x305   :  { %912 = vmatprep.subr.bf16.mxu0 %v2003_v11  ;;  %953 = vmatprep.subr.bf16.mxu1 %v2006_v12 }
 0x306   :  { %942 = vmatprep.mubr.bf16.mxu0 %v2520_v48  ;;  %983 = vmatprep.mubr.bf16.mxu1 %v2520_v48 }
 0x308   :  { %913 = vmatpush1.bf16.msra.mxu0 %v2008_v13  ;;  %954 = vmatpush1.bf16.msra.mxu1 %v2011_v14 }
 0x309   :  { %914 = vmatprep.subr.bf16.mxu0 %v2019_v16  ;;  %955 = vmatprep.subr.bf16.mxu1 %v2022_v17 }
 0x30c   :  { %915 = vmatpush1.bf16.msra.mxu0 %v2024_v18  ;;  %956 = vmatpush1.bf16.msra.mxu1 %v2027_v19 }
 0x30d   :  { %916 = vmatprep.subr.bf16.mxu0 %v2035_v21  ;;  %957 = vmatprep.subr.bf16.mxu1 %v2038_v22 }
 0x310   :  { %917 = vmatpush1.bf16.msra.mxu0 %v2040_v23  ;;  %958 = vmatpush1.bf16.msra.mxu1 %v2043_v24 }
 0x311   :  { %918 = vmatprep.subr.bf16.mxu0 %v2051_v26  ;;  %959 = vmatprep.subr.bf16.mxu1 %v2056_v28 }
 0x314   :  { %919 = vmatpush1.bf16.msra.mxu0 %v2054_v27  ;;  %960 = vmatpush1.bf16.msra.mxu1 %v2059_v29 }
 0x315   :  { %920 = vmatprep.subr.bf16.mxu0 %v2062_v31  ;;  %961 = vmatprep.subr.bf16.mxu1 %v2066_v32 }
 0x318   :  { %921 = vmatpush1.bf16.msra.mxu0 %v2070_v33  ;;  %962 = vmatpush1.bf16.msra.mxu1 %v2072_v34 }
 0x319   :  { %922 = vmatprep.subr.bf16.mxu0 %v2076_v35  ;;  %963 = vmatprep.subr.bf16.mxu1 %v2080_v37 }
 0x31c   :  { %923 = vmatpush1.bf16.msra.mxu0 %v2086_v38  ;;  %964 = vmatpush1.bf16.msra.mxu1 %v2088_v39 }
 0x31d   :  { %924 = vmatprep.subr.bf16.mxu0 %v2092_v40  ;;  %965 = vmatprep.subr.bf16.mxu1 %v2096_v42 }
 0x320   :  { %925 = vmatpush1.bf16.msra.mxu0 %v2102_v43  ;;  %966 = vmatpush1.bf16.msra.mxu1 %v2104_v44 }
 0x321   :  { %1016 = vmatprep.subr.bf16.mxu0 %v1990_v6  ;;  %1057 = vmatprep.subr.bf16.mxu1 %v1992_v7 }
 0x3c3   :  { %v838_v59 = vpop.f32.mrf.mxu0  ;;  %v879_v60 = vpop.f32.mrf.mxu1 }
 0x3c4   :  { %v839_v1 = vadd.f32 %v838_v59, %v2181_v54  ;;  %v880_v63 = vadd.f32 %v879_v60, %v2521_v47 }
 0x3c5   :  { %v840_v2 = vpop.f32.mrf.mxu0  ;;  %v881_v4 = vpop.f32.mrf.mxu1 }
 0x3c6   :  { %v886_v5 = vmul.f32 0.5, %v839_v1  ;;  %v841_v10 = vadd.f32 %v840_v2, %v2185_v56  ;;  %v882_v57 = vadd.f32 %v881_v4, %v2183_v55  ;;  %v888_v0 = vmul.f32 0.5, %v880_v63  ;;  %v2522_v2 = vld [vmem:[#allocation22_spill] sm:$0xff] }
 0x3c7   :  { %v842_v15 = vpop.f32.mrf.mxu0  ;;  %v883_v49 = vpop.f32.mrf.mxu1 }
 0x3c8   :  { %1735 = vtanh.f32 %v886_v5  ;;  %v887_v25 = vmul.f32 0.5, %v841_v10  ;;  %v2523_v49 = vld [vmem:[#allocation24_spill] sm:$0xff] }
 0x3c9   :  { %v843_v61 = vpop.f32.mrf.mxu0  ;;  %v884_v36 = vpop.f32.mrf.mxu1 }
 0x3ca   :  { %1737 = vtanh.f32 %v887_v25 }
 0x3cb   :  { %1739 = vtanh.f32 %v882_v57 }
 0x3cc   :  { %1741 = vtanh.f32 %v888_v0  ;;  %v2524_v0 = vld [vmem:[#allocation23_spill] sm:$0xff] }
 0x3d5   :  { %v1736_v45 = vpop.eup %1735 }
 0x3d6   :  { %v892_v54 = vmul.f32 0.5, %v1736_v45 }
 0x3d7   :  { %v1738_v52 = vpop.eup %1737 }
 0x3d8   :  { %v895_v46 = vadd.f32 0.5, %v892_v54  ;;  %v893_v20 = vmul.f32 0.5, %v1738_v52  ;;  %v1740_v30 = vpop.eup %1739  ;;  %v2525_v54 = vld [vmem:[#allocation21_spill] sm:$0xff] }
 0x3d9   :  { %v1742_v55 = vpop.eup %1741 }
 0x3da   :  { %v896_v56 = vadd.f32 0.5, %v893_v20  ;;  %v900_v62 = vmul.f32 %v1740_v30, %v895_v46  ;;  %v894_v41 = vmul.f32 0.5, %v1742_v55 }
 0x3dc   :  { %v899_v50 = vmul.f32 %v896_v56, %v2264_v51  ;;  %v897_v3 = vadd.f32 0.5, %v894_v41 }
 0x3de   :  { %v2306_v53 = vadd.f32 %v900_v62, %v899_v50 }
 0x3e0   :  { %1743 = vtanh.f32 %v2306_v53 }
 0x3ed   :  { %v1744_v58 = vpop.eup %1743 }
 0x3ee   :  { %v903_v59 = vmul.f32 %v1744_v58, %v897_v3 }
 0x3f0   :  { %v904_v60 = vpack.c.bf16 %v903_v59, %v903_v59 }
 0x3f2   :  { %943 = vmatmul.mubr.bf16.vlgmr.msra.gmra.mxu0 %v904_v60  ;;  %984 = vmatmul.mubr.bf16.vlgmr.msra.gmra.mxu1 %v904_v60 }
 0x3f3   :  { %1017 = vmatpush1.bf16.msra.mxu0 %v1994_v8  ;;  %1058 = vmatpush1.bf16.msra.mxu1 %v1996_v9 }
 0x3f4   :  { %1018 = vmatprep.subr.bf16.mxu0 %v2003_v11  ;;  %1059 = vmatprep.subr.bf16.mxu1 %v2006_v12 }
 0x3f5   :  { %1048 = vmatprep.mubr.bf16.mxu0 %v2520_v48  ;;  %1089 = vmatprep.mubr.bf16.mxu1 %v2520_v48 }
 0x3f7   :  { %1019 = vmatpush1.bf16.msra.mxu0 %v2008_v13  ;;  %1060 = vmatpush1.bf16.msra.mxu1 %v2011_v14 }
 0x3f8   :  { %1020 = vmatprep.subr.bf16.mxu0 %v2019_v16  ;;  %1061 = vmatprep.subr.bf16.mxu1 %v2022_v17 }
 0x3fb   :  { %1021 = vmatpush1.bf16.msra.mxu0 %v2024_v18  ;;  %1062 = vmatpush1.bf16.msra.mxu1 %v2027_v19 }
 0x3fc   :  { %1022 = vmatprep.subr.bf16.mxu0 %v2035_v21  ;;  %1063 = vmatprep.subr.bf16.mxu1 %v2038_v22 }
 0x3ff   :  { %1023 = vmatpush1.bf16.msra.mxu0 %v2040_v23  ;;  %1064 = vmatpush1.bf16.msra.mxu1 %v2043_v24 }
 0x400   :  { %1024 = vmatprep.subr.bf16.mxu0 %v2051_v26  ;;  %1065 = vmatprep.subr.bf16.mxu1 %v2056_v28 }
 0x403   :  { %1025 = vmatpush1.bf16.msra.mxu0 %v2054_v27  ;;  %1066 = vmatpush1.bf16.msra.mxu1 %v2059_v29 }
 0x404   :  { %1026 = vmatprep.subr.bf16.mxu0 %v2062_v31  ;;  %1067 = vmatprep.subr.bf16.mxu1 %v2066_v32 }
 0x407   :  { %1027 = vmatpush1.bf16.msra.mxu0 %v2070_v33  ;;  %1068 = vmatpush1.bf16.msra.mxu1 %v2072_v34 }
 0x408   :  { %1028 = vmatprep.subr.bf16.mxu0 %v2076_v35  ;;  %1069 = vmatprep.subr.bf16.mxu1 %v2080_v37 }
 0x40b   :  { %1029 = vmatpush1.bf16.msra.mxu0 %v2086_v38  ;;  %1070 = vmatpush1.bf16.msra.mxu1 %v2088_v39 }
 0x40c   :  { %1030 = vmatprep.subr.bf16.mxu0 %v2092_v40  ;;  %1071 = vmatprep.subr.bf16.mxu1 %v2096_v42 }
 0x40f   :  { %1031 = vmatpush1.bf16.msra.mxu0 %v2102_v43  ;;  %1072 = vmatpush1.bf16.msra.mxu1 %v2104_v44 }
 0x410   :  { %1122 = vmatprep.subr.bf16.mxu0 %v1990_v6  ;;  %1163 = vmatprep.subr.bf16.mxu1 %v1992_v7 }
 0x4b2   :  { %v944_v51 = vpop.f32.mrf.mxu0  ;;  %v985_v1 = vpop.f32.mrf.mxu1 }
 0x4b3   :  { %v945_v4 = vadd.f32 %v944_v51, %v2522_v2  ;;  %v986_v52 = vadd.f32 %v985_v1, %v2525_v54 }
 0x4b4   :  { %v946_v5 = vpop.f32.mrf.mxu0  ;;  %v987_v10 = vpop.f32.mrf.mxu1 }
 0x4b5   :  { %v992_v15 = vmul.f32 0.5, %v945_v4  ;;  %v947_v25 = vadd.f32 %v946_v5, %v2523_v49  ;;  %v988_v45 = vadd.f32 %v987_v10, %v2524_v0  ;;  %v994_v46 = vmul.f32 0.5, %v986_v52  ;;  %v2527_v10 = vld [vmem:[#allocation28_spill] sm:$0xff] }
 0x4b6   :  { %v948_v61 = vpop.f32.mrf.mxu0  ;;  %v989_v36 = vpop.f32.mrf.mxu1 }
 0x4b7   :  { %1745 = vtanh.f32 %v992_v15  ;;  %v993_v57 = vmul.f32 0.5, %v947_v25 }
 0x4b8   :  { %v949_v47 = vpop.f32.mrf.mxu0  ;;  %v990_v63 = vpop.f32.mrf.mxu1 }
 0x4b9   :  { %1747 = vtanh.f32 %v993_v57  ;;  %v2528_v47 = vld [vmem:[#allocation27_spill] sm:$0xff] }
 0x4ba   :  { %1749 = vtanh.f32 %v988_v45 }
 0x4bb   :  { %1751 = vtanh.f32 %v994_v46 }
 0x4c4   :  { %v1746_v20 = vpop.eup %1745 }
 0x4c5   :  { %v998_v56 = vmul.f32 0.5, %v1746_v20 }
 0x4c6   :  { %v1748_v30 = vpop.eup %1747 }
 0x4c7   :  { %v1001_v50 = vadd.f32 0.5, %v998_v56  ;;  %v999_v62 = vmul.f32 0.5, %v1748_v30  ;;  %v1750_v41 = vpop.eup %1749 }
 0x4c8   :  { %v1752_v60 = vpop.eup %1751 }
 0x4c9   :  { %v1002_v55 = vadd.f32 0.5, %v999_v62  ;;  %v1006_v58 = vmul.f32 %v1750_v41, %v1001_v50  ;;  %v1000_v51 = vmul.f32 0.5, %v1752_v60 }
 0x4cb   :  { %v1005_v3 = vmul.f32 %v1002_v55, %v2306_v53  ;;  %v1003_v2 = vadd.f32 0.5, %v1000_v51 }
 0x4cd   :  { %v2348_v59 = vadd.f32 %v1006_v58, %v1005_v3 }
 0x4cf   :  { %1753 = vtanh.f32 %v2348_v59 }
 0x4dc   :  { %v1754_v1 = vpop.eup %1753 }
 0x4dd   :  { %v1009_v4 = vmul.f32 %v1754_v1, %v1003_v2  ;;  %v2393_v1 = vld [vmem:[#allocation8 + $0xe0] ss:$16 sps:$4 sm:$0xff]  }
 0x4df   :  { %v1010_v5 = vpack.c.bf16 %v1009_v4, %v1009_v4  ;;  %v2396_v4 = vld [vmem:[#allocation8 + $0xe8] ss:$16 sps:$4 sm:$0xff]  }
 0x4e1   :  { %1049 = vmatmul.mubr.bf16.vlgmr.msra.gmra.mxu0 %v1010_v5  ;;  %1090 = vmatmul.mubr.bf16.vlgmr.msra.gmra.mxu1 %v1010_v5  ;;  %v2402_v5 = vld [vmem:[#allocation8 + $0xcc] ss:$16 sps:$4 sm:$0xff]  }
 0x4e2   :  { %1123 = vmatpush1.bf16.msra.mxu0 %v1994_v8  ;;  %1164 = vmatpush1.bf16.msra.mxu1 %v1996_v9 }
 0x4e3   :  { %1124 = vmatprep.subr.bf16.mxu0 %v2003_v11  ;;  %1165 = vmatprep.subr.bf16.mxu1 %v2006_v12  ;;  %v2526_v11 = vld [vmem:[#allocation26_spill] sm:$0xff] }
 0x4e4   :  { %1154 = vmatprep.mubr.bf16.mxu0 %v2520_v48  ;;  %1195 = vmatprep.mubr.bf16.mxu1 %v2520_v48 }
 0x4e6   :  { %1125 = vmatpush1.bf16.msra.mxu0 %v2008_v13  ;;  %1166 = vmatpush1.bf16.msra.mxu1 %v2011_v14 }
 0x4e7   :  { %1126 = vmatprep.subr.bf16.mxu0 %v2019_v16  ;;  %1167 = vmatprep.subr.bf16.mxu1 %v2022_v17 }
 0x4ea   :  { %1127 = vmatpush1.bf16.msra.mxu0 %v2024_v18  ;;  %1168 = vmatpush1.bf16.msra.mxu1 %v2027_v19 }
 0x4eb   :  { %1128 = vmatprep.subr.bf16.mxu0 %v2035_v21  ;;  %1169 = vmatprep.subr.bf16.mxu1 %v2038_v22 }
 0x4ee   :  { %1129 = vmatpush1.bf16.msra.mxu0 %v2040_v23  ;;  %1170 = vmatpush1.bf16.msra.mxu1 %v2043_v24 }
 0x4ef   :  { %1130 = vmatprep.subr.bf16.mxu0 %v2051_v26  ;;  %1171 = vmatprep.subr.bf16.mxu1 %v2056_v28 }
 0x4f2   :  { %1131 = vmatpush1.bf16.msra.mxu0 %v2054_v27  ;;  %1172 = vmatpush1.bf16.msra.mxu1 %v2059_v29 }
 0x4f3   :  { %1132 = vmatprep.subr.bf16.mxu0 %v2062_v31  ;;  %1173 = vmatprep.subr.bf16.mxu1 %v2066_v32 }
 0x4f6   :  { %1133 = vmatpush1.bf16.msra.mxu0 %v2070_v33  ;;  %1174 = vmatpush1.bf16.msra.mxu1 %v2072_v34 }
 0x4f7   :  { %1134 = vmatprep.subr.bf16.mxu0 %v2076_v35  ;;  %1175 = vmatprep.subr.bf16.mxu1 %v2080_v37 }
 0x4fa   :  { %1135 = vmatpush1.bf16.msra.mxu0 %v2086_v38  ;;  %1176 = vmatpush1.bf16.msra.mxu1 %v2088_v39 }
 0x4fb   :  { %1136 = vmatprep.subr.bf16.mxu0 %v2092_v40  ;;  %1177 = vmatprep.subr.bf16.mxu1 %v2096_v42 }
 0x4fe   :  { %1137 = vmatpush1.bf16.msra.mxu0 %v2102_v43  ;;  %1178 = vmatpush1.bf16.msra.mxu1 %v2104_v44 }
 0x4ff   :  { %1228 = vmatprep.subr.bf16.mxu0 %v1990_v6  ;;  %1269 = vmatprep.subr.bf16.mxu1 %v1992_v7  ;;  %v2529_v7 = vld [vmem:[#allocation25_spill] sm:$0xff] }
 0x5a1   :  { %v1050_v8 = vpop.f32.mrf.mxu0  ;;  %v1091_v9 = vpop.f32.mrf.mxu1 }
 0x5a2   :  { %v1051_v12 = vadd.f32 %v1050_v8, %v2526_v11  ;;  %v1092_v63 = vadd.f32 %v1091_v9, %v2529_v7  ;;  %v2407_v8 = vld [vmem:[#allocation8 + $0xc0] ss:$16 sps:$4 sm:$0xff]   ;;  %v2410_v9 = vld [vmem:[#allocation8 + $0xc8] ss:$16 sps:$4 sm:$0xff]   ;;  %v1804_v7 = vld [vmem:[#allocation8 + $0xac] ss:$16 sps:$4 sm:$0xff]  }
 0x5a3   :  { %v1052_v13 = vpop.f32.mrf.mxu0  ;;  %v1093_v14 = vpop.f32.mrf.mxu1 }
 0x5a4   :  { %v1098_v53 = vmul.f32 0.5, %v1051_v12  ;;  %v1053_v15 = vadd.f32 %v1052_v13, %v2527_v10  ;;  %v1094_v6 = vadd.f32 %v1093_v14, %v2528_v47  ;;  %v1100_v0 = vmul.f32 0.5, %v1092_v63  ;;  %v1805_v63 = vld [vmem:[#allocation8 + $0xa0] ss:$16 sps:$4 sm:$0xff]  }
 0x5a5   :  { %v1054_v49 = vpop.f32.mrf.mxu0  ;;  %v1095_v25 = vpop.f32.mrf.mxu1 }
 0x5a6   :  { %1755 = vtanh.f32 %v1098_v53  ;;  %v1099_v61 = vmul.f32 0.5, %v1053_v15 }
 0x5a7   :  { %v1055_v36 = vpop.f32.mrf.mxu0  ;;  %v1096_v57 = vpop.f32.mrf.mxu1 }
 0x5a8   :  { %1757 = vtanh.f32 %v1099_v61 }
 0x5a9   :  { %1759 = vtanh.f32 %v1094_v6  ;;  %v1803_v6 = vld [vmem:[#allocation8 + $0xa4] ss:$16 sps:$4 sm:$0xff]  }
 0x5aa   :  { %1761 = vtanh.f32 %v1100_v0  ;;  %v1806_v0 = vld [vmem:[#allocation8 + $0xa8] ss:$16 sps:$4 sm:$0xff]  }
 0x5b3   :  { %v1756_v45 = vpop.eup %1755 }
 0x5b4   :  { %v1104_v54 = vmul.f32 0.5, %v1756_v45  ;;  %v1807_v45 = vld [vmem:[#allocation8 + $0x84] ss:$16 sps:$4 sm:$0xff]  }
 0x5b5   :  { %v1758_v52 = vpop.eup %1757 }
 0x5b6   :  { %v1107_v46 = vadd.f32 0.5, %v1104_v54  ;;  %v1105_v20 = vmul.f32 0.5, %v1758_v52  ;;  %v1760_v30 = vpop.eup %1759  ;;  %v1808_v54 = vld [vmem:[#allocation8 + $0x8c] ss:$16 sps:$4 sm:$0xff]   ;;  %v1809_v52 = vld [vmem:[#allocation8 + $0x80] ss:$16 sps:$4 sm:$0xff]  }
 0x5b7   :  { %v1762_v41 = vpop.eup %1761 }
 0x5b8   :  { %v1108_v56 = vadd.f32 0.5, %v1105_v20  ;;  %v1112_v62 = vmul.f32 %v1760_v30, %v1107_v46  ;;  %v1106_v3 = vmul.f32 0.5, %v1762_v41  ;;  %v1810_v46 = vld [vmem:[#allocation8 + $0x88] ss:$16 sps:$4 sm:$0xff]   ;;  %v1812_v20 = vld [vmem:[#allocation8 + $0x6c] ss:$16 sps:$4 sm:$0xff]  }
 0x5b9   :  { %v1814_v30 = vld [vmem:[#allocation8 + $0x68] ss:$16 sps:$4 sm:$0xff]  }
 0x5ba   :  { %v1111_v50 = vmul.f32 %v1108_v56, %v2348_v59  ;;  %v1109_v58 = vadd.f32 0.5, %v1106_v3  ;;  %v2399_v59 = vld [vmem:[#allocation8 + $0xc4] ss:$16 sps:$4 sm:$0xff]   ;;  %v1813_v56 = vld [vmem:[#allocation8 + $0x60] ss:$16 sps:$4 sm:$0xff]  }
 0x5bb   :  { %v1818_v41 = vld [vmem:[#allocation8 + $0x48] ss:$16 sps:$4 sm:$0xff]   ;;  %v1819_v3 = vld [vmem:[#allocation8 + $0x24] ss:$16 sps:$4 sm:$0xff]  }
 0x5bc   :  { %v2390_v55 = vadd.f32 %v1112_v62, %v1111_v50  ;;  %v1815_v50 = vld [vmem:[#allocation8 + $0x44] ss:$16 sps:$4 sm:$0xff]   ;;  %v1816_v62 = vld [vmem:[#allocation8 + $0x4c] ss:$16 sps:$4 sm:$0xff]  }
 0x5be   :  { %1763 = vtanh.f32 %v2390_v55 }
 0x5cb   :  { %v1764_v60 = vpop.eup %1763 }
 0x5cc   :  { %v1115_v51 = vmul.f32 %v1764_v60, %v1109_v58  ;;  %v1820_v58 = vld [vmem:[#allocation8 + $0x2c] ss:$16 sps:$4 sm:$0xff]   ;;  %v1821_v60 = vld [vmem:[#allocation8 + $0x20] ss:$16 sps:$4 sm:$0xff]  }
 0x5ce   :  { %v1116_v2 = vpack.c.bf16 %v1115_v51, %v1115_v51  ;;  %v1822_v51 = vld [vmem:[#allocation8 + $0x28] ss:$16 sps:$4 sm:$0xff]  }
 0x5d0   :  { %1155 = vmatmul.mubr.bf16.vlgmr.msra.gmra.mxu0 %v1116_v2  ;;  %1196 = vmatmul.mubr.bf16.vlgmr.msra.gmra.mxu1 %v1116_v2  ;;  %v1823_v2 = vld [vmem:[#allocation8 + $0x4] ss:$16 sps:$4 sm:$0xff]  }
 0x5d1   :  { %1229 = vmatpush1.bf16.msra.mxu0 %v2393_v1  ;;  %1270 = vmatpush1.bf16.msra.mxu1 %v2396_v4 }
 0x5d2   :  { %1230 = vmatprep.subr.bf16.mxu0 %v2399_v59  ;;  %1271 = vmatprep.subr.bf16.mxu1 %v2402_v5 }
 0x5d3   :  { %1260 = vmatprep.mubr.bf16.mxu0 %v2520_v48  ;;  %1301 = vmatprep.mubr.bf16.mxu1 %v2520_v48 }
 0x5d5   :  { %1231 = vmatpush1.bf16.msra.mxu0 %v2407_v8  ;;  %1272 = vmatpush1.bf16.msra.mxu1 %v2410_v9 }
 0x5d6   :  { %1232 = vmatprep.subr.bf16.mxu0 %v2019_v16  ;;  %1273 = vmatprep.subr.bf16.mxu1 %v2022_v17  ;;  %v1801_v16 = vld [vmem:[#allocation8 + $0xe4] ss:$16 sps:$4 sm:$0xff]   ;;  %v1802_v17 = vld [vmem:[#allocation8 + $0xec] ss:$16 sps:$4 sm:$0xff]  }
 0x5d9   :  { %1233 = vmatpush1.bf16.msra.mxu0 %v2024_v18  ;;  %1274 = vmatpush1.bf16.msra.mxu1 %v2027_v19 }
 0x5da   :  { %1234 = vmatprep.subr.bf16.mxu0 %v2035_v21  ;;  %1275 = vmatprep.subr.bf16.mxu1 %v2038_v22  ;;  %v2530_v21 = vld [vmem:[#allocation30_spill] sm:$0xff] }
 0x5dd   :  { %1235 = vmatpush1.bf16.msra.mxu0 %v2040_v23  ;;  %1276 = vmatpush1.bf16.msra.mxu1 %v2043_v24 }
 0x5de   :  { %1236 = vmatprep.subr.bf16.mxu0 %v2051_v26  ;;  %1277 = vmatprep.subr.bf16.mxu1 %v2056_v28 }
 0x5e1   :  { %1237 = vmatpush1.bf16.msra.mxu0 %v2054_v27  ;;  %1278 = vmatpush1.bf16.msra.mxu1 %v2059_v29  ;;  %v2531_v27 = vld [vmem:[#allocation32_spill] sm:$0xff] }
 0x5e2   :  { %1238 = vmatprep.subr.bf16.mxu0 %v2062_v31  ;;  %1279 = vmatprep.subr.bf16.mxu1 %v2066_v32 }
 0x5e5   :  { %1239 = vmatpush1.bf16.msra.mxu0 %v2070_v33  ;;  %1280 = vmatpush1.bf16.msra.mxu1 %v2072_v34 }
 0x5e6   :  { %1240 = vmatprep.subr.bf16.mxu0 %v2076_v35  ;;  %1281 = vmatprep.subr.bf16.mxu1 %v2080_v37  ;;  %v2532_v35 = vld [vmem:[#allocation31_spill] sm:$0xff] }
 0x5e9   :  { %1241 = vmatpush1.bf16.msra.mxu0 %v2086_v38  ;;  %1282 = vmatpush1.bf16.msra.mxu1 %v2088_v39  ;;  %v2533_v38 = vld [vmem:[#allocation29_spill] sm:$0xff] }
 0x5ea   :  { %1242 = vmatprep.subr.bf16.mxu0 %v2092_v40  ;;  %1283 = vmatprep.subr.bf16.mxu1 %v2096_v42 }
 0x5ed   :  { %1243 = vmatpush1.bf16.msra.mxu0 %v2102_v43  ;;  %1284 = vmatpush1.bf16.msra.mxu1 %v2104_v44 }
 0x5ee   :  { %1329 = vmatprep.subr.bf16.mxu0 %v1801_v16  ;;  %1370 = vmatprep.subr.bf16.mxu1 %v1802_v17  ;;  %v2535_v16 = vld [vmem:[#allocation34_spill] sm:$0xff] }
 0x690   :  { %v1156_v18 = vpop.f32.mrf.mxu0  ;;  %v1197_v19 = vpop.f32.mrf.mxu1 }
 0x691   :  { %v1157_v22 = vadd.f32 %v1156_v18, %v2530_v21  ;;  %v1198_v39 = vadd.f32 %v1197_v19, %v2533_v38 }
 0x692   :  { %v1158_v23 = vpop.f32.mrf.mxu0  ;;  %v1199_v24 = vpop.f32.mrf.mxu1 }
 0x693   :  { %v1204_v26 = vmul.f32 0.5, %v1157_v22  ;;  %v1159_v28 = vadd.f32 %v1158_v23, %v2531_v27  ;;  %v1200_v37 = vadd.f32 %v1199_v24, %v2532_v35  ;;  %v1206_v40 = vmul.f32 0.5, %v1198_v39  ;;  %v2536_v22 = vld [vmem:[#allocation36_spill] sm:$0xff] }
 0x694   :  { %v1160_v29 = vpop.f32.mrf.mxu0  ;;  %v1201_v31 = vpop.f32.mrf.mxu1 }
 0x695   :  { %1765 = vtanh.f32 %v1204_v26  ;;  %v1205_v32 = vmul.f32 0.5, %v1159_v28  ;;  %v2537_v31 = vld [vmem:[#allocation35_spill] sm:$0xff] }
 0x696   :  { %v1161_v33 = vpop.f32.mrf.mxu0  ;;  %v1202_v34 = vpop.f32.mrf.mxu1 }
 0x697   :  { %1767 = vtanh.f32 %v1205_v32  ;;  %v2538_v33 = vld [vmem:[#allocation33_spill] sm:$0xff] }
 0x698   :  { %1769 = vtanh.f32 %v1200_v37 }
 0x699   :  { %1771 = vtanh.f32 %v1206_v40 }
 0x6a2   :  { %v1766_v42 = vpop.eup %1765 }
 0x6a3   :  { %v1210_v43 = vmul.f32 0.5, %v1766_v42 }
 0x6a4   :  { %v1768_v44 = vpop.eup %1767 }
 0x6a5   :  { %v1213_v11 = vadd.f32 0.5, %v1210_v43  ;;  %v1211_v12 = vmul.f32 0.5, %v1768_v44  ;;  %v1770_v14 = vpop.eup %1769 }
 0x6a6   :  { %v1772_v49 = vpop.eup %1771 }
 0x6a7   :  { %v1214_v13 = vadd.f32 0.5, %v1211_v12  ;;  %v1218_v10 = vmul.f32 %v1770_v14, %v1213_v11  ;;  %v1212_v25 = vmul.f32 0.5, %v1772_v49 }
 0x6a9   :  { %v1217_v53 = vmul.f32 %v1214_v13, %v2390_v55  ;;  %v1215_v61 = vadd.f32 0.5, %v1212_v25  ;;  %v1817_v55 = vld [vmem:[#allocation8 + $0x40] ss:$16 sps:$4 sm:$0xff]  }
 0x6ab   :  { %v2442_v15 = vadd.f32 %v1218_v10, %v1217_v53 }
 0x6ad   :  { %1773 = vtanh.f32 %v2442_v15 }
 0x6ba   :  { %v1774_v36 = vpop.eup %1773 }
 0x6bb   :  { %v1221_v57 = vmul.f32 %v1774_v36, %v1215_v61  ;;  %v1444_v36 = vld [vmem:[#allocation9 + $0x78] sm:$0xff] }
 0x6bd   :  { %v1222_v47 = vpack.c.bf16 %v1221_v57, %v1221_v57  ;;  %v1443_v57 = vld [vmem:[#allocation9 + $0x70] sm:$0xff] }
 0x6bf   :  { %1261 = vmatmul.mubr.bf16.vlgmr.msra.gmra.mxu0 %v1222_v47  ;;  %1302 = vmatmul.mubr.bf16.vlgmr.msra.gmra.mxu1 %v1222_v47  ;;  %v1441_v47 = vld [vmem:[#allocation9 + $0x60] sm:$0xff] }
 0x6c0   :  { %1330 = vmatpush1.bf16.msra.mxu0 %v2393_v1  ;;  %1371 = vmatpush1.bf16.msra.mxu1 %v2396_v4  ;;  %v1824_v1 = vld [vmem:[#allocation8 + $0xc] ss:$16 sps:$4 sm:$0xff]   ;;  %v1825_v4 = vld [vmem:[#allocation8] ss:$16 sps:$4 sm:$0xff]  }
 0x6c1   :  { %1331 = vmatprep.subr.bf16.mxu0 %v2399_v59  ;;  %1372 = vmatprep.subr.bf16.mxu1 %v2402_v5  ;;  %v1826_v59 = vld [vmem:[#allocation8 + $0x8] ss:$16 sps:$4 sm:$0xff]   ;;  %v2534_v5 = vmov 0.0  }
 0x6c2   :  { %1361 = vmatprep.mubr.bf16.mxu0 %v2520_v48  ;;  %1402 = vmatprep.mubr.bf16.mxu1 %v2520_v48  ;;  %v1811_v48 = vld [vmem:[#allocation8 + $0x64] ss:$16 sps:$4 sm:$0xff]  }
 0x6c4   :  { %1332 = vmatpush1.bf16.msra.mxu0 %v2407_v8  ;;  %1373 = vmatpush1.bf16.msra.mxu1 %v2410_v9 }
 0x6c5   :  { %1333 = vmatprep.subr.bf16.mxu0 %v1803_v6  ;;  %1374 = vmatprep.subr.bf16.mxu1 %v1804_v7  ;;  %v1440_v6 = vld [vmem:[#allocation9 + $0x58] sm:$0xff]  ;;  %v1439_v7 = vld [vmem:[#allocation9 + $0x50] sm:$0xff] }
 0x6c8   :  { %1334 = vmatpush1.bf16.msra.mxu0 %v1805_v63  ;;  %1375 = vmatpush1.bf16.msra.mxu1 %v1806_v0  ;;  %v1438_v63 = vld [vmem:[#allocation9 + $0x48] sm:$0xff]  ;;  %v1437_v0 = vld [vmem:[#allocation9 + $0x40] sm:$0xff] }
 0x6c9   :  { %1335 = vmatprep.subr.bf16.mxu0 %v1807_v45  ;;  %1376 = vmatprep.subr.bf16.mxu1 %v1808_v54  ;;  %v1436_v45 = vld [vmem:[#allocation9 + $0x38] sm:$0xff]  ;;  %v1435_v54 = vld [vmem:[#allocation9 + $0x30] sm:$0xff] }
 0x6cc   :  { %1336 = vmatpush1.bf16.msra.mxu0 %v1809_v52  ;;  %1377 = vmatpush1.bf16.msra.mxu1 %v1810_v46  ;;  %v1434_v52 = vld [vmem:[#allocation9 + $0x28] sm:$0xff]  ;;  %v1433_v46 = vld [vmem:[#allocation9 + $0x20] sm:$0xff] }
 0x6cd   :  { %1337 = vmatprep.subr.bf16.mxu0 %v1811_v48  ;;  %1378 = vmatprep.subr.bf16.mxu1 %v1812_v20  ;;  %v1432_v48 = vld [vmem:[#allocation9 + $0x18] sm:$0xff]  ;;  %v1431_v20 = vld [vmem:[#allocation9 + $0x10] sm:$0xff] }
 0x6d0   :  { %1338 = vmatpush1.bf16.msra.mxu0 %v1813_v56  ;;  %1379 = vmatpush1.bf16.msra.mxu1 %v1814_v30  ;;  %v1430_v56 = vld [vmem:[#allocation9 + $0x8] sm:$0xff]  ;;  %v1429_v30 = vld [vmem:[#allocation9] sm:$0xff] }
 0x6d1   :  { %1339 = vmatprep.subr.bf16.mxu0 %v1815_v50  ;;  %1380 = vmatprep.subr.bf16.mxu1 %v1816_v62 }
 0x6d4   :  { %1340 = vmatpush1.bf16.msra.mxu0 %v1817_v55  ;;  %1381 = vmatpush1.bf16.msra.mxu1 %v1818_v41  ;;  %v2539_v55 = vld [vmem:[#allocation16_spill] sm:$0xff] }
 0x6d5   :  { %1341 = vmatprep.subr.bf16.mxu0 %v1819_v3  ;;  %1382 = vmatprep.subr.bf16.mxu1 %v1820_v58 }
 0x6d8   :  { %1342 = vmatpush1.bf16.msra.mxu0 %v1821_v60  ;;  %1383 = vmatpush1.bf16.msra.mxu1 %v1822_v51  ;;  %v2540_v51 = vld [vmem:[#allocation18_spill] sm:$0xff] }
 0x6d9   :  { %1343 = vmatprep.subr.bf16.mxu0 %v1823_v2  ;;  %1384 = vmatprep.subr.bf16.mxu1 %v1824_v1 }
 0x6dc   :  { %1344 = vmatpush1.bf16.msra.mxu0 %v1825_v4  ;;  %1385 = vmatpush1.bf16.msra.mxu1 %v1826_v59 }
 0x6dd   :  { %1610 = vmatprep.subr.mxu0 %v2534_v5 }
 0x77f   :  { %v1262_v8 = vpop.f32.mrf.mxu0  ;;  %v1303_v9 = vpop.f32.mrf.mxu1 }
 0x780   :  { %v1263_v17 = vadd.f32 %v1262_v8, %v2535_v16  ;;  %v1304_v34 = vadd.f32 %v1303_v9, %v2538_v33  ;;  %v2541_v16 = vld [vmem:[#allocation19_spill] sm:$0xff] }
 0x781   :  { %v1264_v18 = vpop.f32.mrf.mxu0  ;;  %v1305_v19 = vpop.f32.mrf.mxu1 }
 0x782   :  { %v1310_v21 = vmul.f32 0.5, %v1263_v17  ;;  %v1265_v23 = vadd.f32 %v1264_v18, %v2536_v22  ;;  %v1306_v32 = vadd.f32 %v1305_v19, %v2537_v31  ;;  %v1312_v35 = vmul.f32 0.5, %v1304_v34 }
 0x783   :  { %v1266_v24 = vpop.f32.mrf.mxu0  ;;  %v1307_v26 = vpop.f32.mrf.mxu1 }
 0x784   :  { %1775 = vtanh.f32 %v1310_v21  ;;  %v1311_v27 = vmul.f32 0.5, %v1265_v23 }
 0x785   :  { %v1267_v28 = vpop.f32.mrf.mxu0  ;;  %v1308_v29 = vpop.f32.mrf.mxu1 }
 0x786   :  { %1777 = vtanh.f32 %v1311_v27 }
 0x787   :  { %1779 = vtanh.f32 %v1306_v32 }
 0x788   :  { %1781 = vtanh.f32 %v1312_v35 }
 0x791   :  { %v1776_v37 = vpop.eup %1775 }
 0x792   :  { %v1316_v38 = vmul.f32 0.5, %v1776_v37 }
 0x793   :  { %v1778_v39 = vpop.eup %1777 }
 0x794   :  { %v1319_v40 = vadd.f32 0.5, %v1316_v38  ;;  %v1317_v42 = vmul.f32 0.5, %v1778_v39  ;;  %v1780_v44 = vpop.eup %1779  ;;  %v1592_v39 = vld [vmem:[#allocation9 + $0x80] ss:$0 sm:$0xff] }
 0x795   :  { %v1782_v14 = vpop.eup %1781 }
 0x796   :  { %v1320_v43 = vadd.f32 0.5, %v1317_v42  ;;  %v1324_v12 = vmul.f32 %v1780_v44, %v1319_v40  ;;  %v1318_v53 = vmul.f32 0.5, %v1782_v14 }
 0x798   :  { %v1323_v11 = vmul.f32 %v1320_v43, %v2442_v15  ;;  %v1321_v10 = vadd.f32 0.5, %v1318_v53  ;;  %v1442_v15 = vld [vmem:[#allocation9 + $0x68] sm:$0xff] }
 0x79a   :  { %v2459_v13 = vadd.f32 %v1324_v12, %v1323_v11 }
 0x79c   :  { %1783 = vtanh.f32 %v2459_v13 }
 0x7a9   :  { %v1784_v49 = vpop.eup %1783 }
 0x7aa   :  { %v1327_v25 = vmul.f32 %v1784_v49, %v1321_v10 }
 0x7ac   :  { %v1328_v61 = vpack.c.bf16 %v1327_v25, %v1327_v25 }
 0x7ae   :  { %1362 = vmatmul.mubr.bf16.vlgmr.msra.gmra.mxu0 %v1328_v61  ;;  %1403 = vmatmul.mubr.bf16.vlgmr.msra.gmra.mxu1 %v1328_v61 }
 0x7af   :  { %1611 = vmatpush3.msra.mxu0 %v1444_v36  ;;  %1642 = vmatprep.mubr.msk.f32.mxu0 %vm1945_vm3, %v2534_v5 }
 0x7b0   :  { %1612 = vmatprep.subr.mxu0 %v2534_v5 }
 0x7b1   :  { %1613 = vmatpush3.msra.mxu0 %v1443_v57 }
 0x7b2   :  { %1614 = vmatprep.subr.mxu0 %v2534_v5 }
 0x7b3   :  { %1615 = vmatpush3.msra.mxu0 %v1442_v15 }
 0x7b4   :  { %1616 = vmatprep.subr.mxu0 %v2534_v5 }
 0x7b5   :  { %1617 = vmatpush3.msra.mxu0 %v1441_v47 }
 0x7b6   :  { %1618 = vmatprep.subr.mxu0 %v2534_v5 }
 0x7b7   :  { %1619 = vmatpush3.msra.mxu0 %v1440_v6 }
 0x7b8   :  { %1620 = vmatprep.subr.mxu0 %v2534_v5 }
 0x7b9   :  { %1621 = vmatpush3.msra.mxu0 %v1439_v7 }
 0x7ba   :  { %1622 = vmatprep.subr.mxu0 %v2534_v5 }
 0x7bb   :  { %1623 = vmatpush3.msra.mxu0 %v1438_v63 }
 0x7bc   :  { %1624 = vmatprep.subr.mxu0 %v2534_v5 }
 0x7bd   :  { %1625 = vmatpush3.msra.mxu0 %v1437_v0 }
 0x7be   :  { %1626 = vmatprep.subr.mxu0 %v2534_v5 }
 0x7bf   :  { %1627 = vmatpush3.msra.mxu0 %v1436_v45 }
 0x7c0   :  { %1628 = vmatprep.subr.mxu0 %v2534_v5 }
 0x7c1   :  { %1629 = vmatpush3.msra.mxu0 %v1435_v54 }
 0x7c2   :  { %1630 = vmatprep.subr.mxu0 %v2534_v5 }
 0x7c3   :  { %1631 = vmatpush3.msra.mxu0 %v1434_v52 }
 0x7c4   :  { %1632 = vmatprep.subr.mxu0 %v2534_v5 }
 0x7c5   :  { %1633 = vmatpush3.msra.mxu0 %v1433_v46 }
 0x7c6   :  { %1634 = vmatprep.subr.mxu0 %v2534_v5 }
 0x7c7   :  { %1635 = vmatpush3.msra.mxu0 %v1432_v48 }
 0x7c8   :  { %1636 = vmatprep.subr.mxu0 %v2534_v5 }
 0x7c9   :  { %1637 = vmatpush3.msra.mxu0 %v1431_v20 }
 0x7ca   :  { %1638 = vmatprep.subr.mxu0 %v2534_v5 }
 0x7cb   :  { %1639 = vmatpush3.msra.mxu0 %v1430_v56 }
 0x7cc   :  { %1640 = vmatprep.subr.mxu0 %v2534_v5  ;;  %v2542_v5 = vld [vmem:[#allocation17_spill] sm:$0xff] }
 0x7cd   :  { %1641 = vmatpush3.msra.mxu0 %v1429_v30 }
 0x86e   :  { %v1363_v50 = vpop.f32.mrf.mxu0  ;;  %v1404_v62 = vpop.f32.mrf.mxu1 }
 0x86f   :  { %v1364_v41 = vadd.f32 %v1363_v50, %v2539_v55  ;;  %v1405_v18 = vadd.f32 %v1404_v62, %v2542_v5 }
 0x870   :  { %v1365_v3 = vpop.f32.mrf.mxu0  ;;  %v1406_v58 = vpop.f32.mrf.mxu1 }
 0x871   :  { %v1411_v60 = vmul.f32 0.5, %v1364_v41  ;;  %v1366_v2 = vadd.f32 %v1365_v3, %v2540_v51  ;;  %v1407_v17 = vadd.f32 %v1406_v58, %v2541_v16  ;;  %v1413_v19 = vmul.f32 0.5, %v1405_v18 }
 0x872   :  { %v1367_v1 = vpop.f32.mrf.mxu0  ;;  %v1408_v4 = vpop.f32.mrf.mxu1 }
 0x873   :  { %1785 = vtanh.f32 %v1411_v60  ;;  %v1412_v59 = vmul.f32 0.5, %v1366_v2 }
 0x874   :  { %v1368_v8 = vpop.f32.mrf.mxu0  ;;  %v1409_v9 = vpop.f32.mrf.mxu1 }
 0x875   :  { %1787 = vtanh.f32 %v1412_v59 }
 0x876   :  { %1789 = vtanh.f32 %v1407_v17 }
 0x877   :  { %1791 = vtanh.f32 %v1413_v19 }
 0x880   :  { %v1786_v21 = vpop.eup %1785 }
 0x881   :  { %v1417_v22 = vmul.f32 0.5, %v1786_v21 }
 0x882   :  { %v1788_v23 = vpop.eup %1787 }
 0x883   :  { %v1420_v24 = vadd.f32 0.5, %v1417_v22  ;;  %v1418_v26 = vmul.f32 0.5, %v1788_v23  ;;  %v1790_v28 = vpop.eup %1789 }
 0x884   :  { %v1792_v33 = vpop.eup %1791 }
 0x885   :  { %v1421_v27 = vadd.f32 0.5, %v1418_v26  ;;  %v1425_v31 = vmul.f32 %v1790_v28, %v1420_v24  ;;  %v1419_v34 = vmul.f32 0.5, %v1792_v33 }
 0x887   :  { %v1424_v29 = vmul.f32 %v1421_v27, %v2459_v13  ;;  %v1422_v35 = vadd.f32 0.5, %v1419_v34 }
 0x889   :  { %v1426_v32 = vadd.f32 %v1425_v31, %v1424_v29 }
 0x88b   :  { %1793 = vtanh.f32 %v1426_v32 }
 0x898   :  { %v1794_v37 = vpop.eup %1793 }
 0x899   :  { %v1428_v38 = vmul.f32 %v1794_v37, %v1422_v35 }
 0x89b   :  { %1643 = vmatmul.mubr.f32.vlgmr.msra.gmra.mxu0 %v1428_v38 }
 0x95b   :  { %v1516_v40 = vpop.f32.mrf.mxu0 }
 0x95c   :  { %v1517_v42 = vadd.f32 %v1592_v39, %v1516_v40 }
 0x95d   :  { %v1644_v43 = vpop.f32.mrf.mxu0 }
 0x95e   :  { %1520 = vst [vmem:[#allocation11] sm:$0xff] %v1517_v42 }
 0x95f   :  { %1918 = shalt.err (!%p1915_p10)
}
 0x960   :  { %1530 = dma.vmem_to_hbm [thread:$0]  %s1528_s3, 128, %s2490_s4, [#allocation5]  }
 0x961   :  { %1933 = dma.done.wait [#allocation5], 128  }
 0x962   :  { %1934 = vsyncadd [#allocation5], 4294967168 }
 0x963   :  { %1534 = vsyncpa [#allocation4], 1 }
 0x964   :  { %1535 = vsyncpa [#allocation7], 1 }
 0x965   :  { %1536 = vsyncpa [#allocation10], 1 }
 0x966   :  { %1537 = vsyncpa [#allocation5], 1 }

</bundles_post_ra>
